<compile_context>
chip_gen: v7x
topology: tpu7x:2x2x1
jax: 0.10.0
libtpu: 0.0.40
codegen_flags: <defaults>
</compile_context>

<pallas_src>
import jax
import jax.numpy as jnp
from jax.experimental import pallas as pl
from jax.experimental.pallas import tpu as pltpu

# ---------------- mini-BERT config (synthetic, deterministic weights) --------
VOCAB = 64        # vocab size
TYPE_VOCAB = 2    # token type vocab
MAX_POS = 16      # max position embeddings
B = 2             # batch
S = 8             # sequence length
H = 32            # hidden size
NH = 2            # attention heads
HD = H // NH      # head dim
FF = 64           # intermediate (FFN) size
LAYERS = 2        # encoder layers
LN_EPS = 1e-12    # BERT LayerNorm eps

# Row offsets inside the packed embedding slab: [word | pos | type | ln_g | ln_b]
_OFF_POS = VOCAB
_OFF_TYPE = VOCAB + MAX_POS
_OFF_LNG = _OFF_TYPE + TYPE_VOCAB
_OFF_LNB = _OFF_LNG + 1
EMB_ROWS = _OFF_LNB + 1

VW = 3 * H        # width of each row in the per-layer bias/LN vector slab (>= FF)


def _layer_norm(x, g, b):
    mu = jnp.mean(x, axis=-1, keepdims=True)
    var = jnp.mean((x - mu) ** 2, axis=-1, keepdims=True)
    return (x - mu) * jax.lax.rsqrt(var + LN_EPS) * g + b


def _mxu(a_f32, w_bf16):
    # bf16 operands -> native single-pass MXU path; accumulate in f32.
    return jnp.dot(a_f32.astype(jnp.bfloat16), w_bf16,
                   preferred_element_type=jnp.float32)


# ---------------------------- fused Pallas kernel -----------------------------
def simcse_kernel(tok_ref, mask_ref, emb_ref, vec_ref,
                  wqkv_ref, wo_ref, w1_ref, w2_ref, out_ref):
    f32 = jnp.float32
    bf16 = jnp.bfloat16

    # ---- in-kernel embedding lookup -------------------------------------------
    # Word embedding: one-hot (B*S, VOCAB) @ (VOCAB, H) MXU gather (exact: 0/1 LHS).
    ids = tok_ref[:, 0:1]                                     # (B*S, 1) int32
    tt = tok_ref[:, 1:2].astype(f32)                          # (B*S, 1) token types
    col = jax.lax.broadcasted_iota(jnp.int32, (B * S, VOCAB), 1)
    one_hot = jnp.where(ids == col, 1.0, 0.0)                 # f32 exact 0/1
    we = jnp.dot(one_hot, emb_ref[0:VOCAB, :], preferred_element_type=f32)

    # Position embedding: tile the first S rows across the batch (sublane concat).
    pe = jnp.concatenate([emb_ref[_OFF_POS:_OFF_POS + S, :]] * B, axis=0)

    # Type embedding: TYPE_VOCAB == 2 -> linear select, no gather needed.
    t0 = emb_ref[_OFF_TYPE:_OFF_TYPE + 1, :]
    t1 = emb_ref[_OFF_TYPE + 1:_OFF_TYPE + 2, :]
    te = t0 + tt * (t1 - t0)

    x = _layer_norm(we + pe + te,
                    emb_ref[_OFF_LNG:_OFF_LNG + 1, :],
                    emb_ref[_OFF_LNB:_OFF_LNB + 1, :])        # (B*S, H) f32

    # ---- additive attention-mask bias (keys only), built in-kernel -------------
    bias = jnp.where(mask_ref[...] == 0, -1e9, 0.0)            # (B, 1, S) f32
    scale = 1.0 / (HD ** 0.5)

    for l in range(LAYERS):                                    # static unroll over layers
        # Per-layer bias / LayerNorm vectors from the packed slab.
        bqkv = vec_ref[l, 0:1, :]                              # (1, 3H) = [bq|bk|bv]
        bo = vec_ref[l, 1:2, 0:H]
        g1 = vec_ref[l, 2:3, 0:H]
        be1 = vec_ref[l, 3:4, 0:H]
        f1 = vec_ref[l, 4:5, 0:FF]
        f2 = vec_ref[l, 5:6, 0:H]
        g2 = vec_ref[l, 6:7, 0:H]
        be2 = vec_ref[l, 7:8, 0:H]

        # Fused Q/K/V projection: one (B*S,H) @ (H,3H) bf16 matmul.
        qkv = _mxu(x, wqkv_ref[l]) + bqkv                      # (B*S, 3H) f32

        ctx_heads = []
        for hh in range(NH):                                   # tiny static head unroll
            c = hh * HD
            qh = qkv[:, c:c + HD].reshape(B, S, HD).astype(bf16)
            kh = qkv[:, H + c:H + c + HD].reshape(B, S, HD).astype(bf16)
            vh = qkv[:, 2 * H + c:2 * H + c + HD].reshape(B, S, HD).astype(bf16)
            s = jnp.einsum('bqd,bkd->bqk', qh, kh,
                           preferred_element_type=f32) * scale + bias
            m = jnp.max(s, axis=-1, keepdims=True)
            p = jnp.exp(s - m)                                 # denom >= 1 -> no NaN
            p = p * pl.reciprocal(jnp.sum(p, axis=-1, keepdims=True), approx=True)
            ch = jnp.einsum('bqk,bkd->bqd', p.astype(bf16), vh,
                            preferred_element_type=f32)
            ctx_heads.append(ch.reshape(B * S, HD))
        ctx = jnp.concatenate(ctx_heads, axis=-1)              # (B*S, H) f32

        attn = _mxu(ctx, wo_ref[l]) + bo
        h1 = _layer_norm(x + attn, g1, be1)

        ff = _mxu(h1, w1_ref[l]) + f1
        ff = jax.nn.gelu(ff, approximate=True)                 # tanh-approx GELU (BERT)
        ff = _mxu(ff, w2_ref[l]) + f2
        x = _layer_norm(h1 + ff, g2, be2)

    # ---- CLS pooling inside the kernel: row 0 of every sequence ----------------
    out_ref[...] = jnp.concatenate([x[b * S:b * S + 1, :] for b in range(B)], axis=0)


# ------------------------------- wrapper ---------------------------------------
def simcse_forward(input_ids, attention_mask, token_type_ids, packed):
    # Only tiny int "plumbing" here; all FLOP-carrying work (gathers included)
    # happens inside the single Pallas kernel.  jit this wrapper -> one dispatch.
    tok = jnp.stack([input_ids.reshape(-1), token_type_ids.reshape(-1)],
                    axis=-1).astype(jnp.int32)                 # (B*S, 2)
    mask = attention_mask.reshape(B, 1, S).astype(jnp.int32)   # (B, 1, S)

    vmem = pl.BlockSpec(memory_space=pltpu.MemorySpace.VMEM)
    operands = (tok, mask, packed["emb"], packed["vec"],
                packed["wqkv"], packed["wo"], packed["w1"], packed["w2"])

    return pl.pallas_call(
        simcse_kernel,
        out_shape=jax.ShapeDtypeStruct((B, H), jnp.float32),
        in_specs=[vmem] * len(operands),
        out_specs=vmem,
    )(*operands)


# ------------------------- parameter init & packing ---------------------------
def init_params(key):
    # TODO(synk): real SimCSE loads HF-pretrained BERT weights; synthetic mini-BERT here.
    ks = jax.random.split(key, 24)

    def nrm(k, shape, scale=0.02):
        return (scale * jax.random.normal(k, shape)).astype(jnp.float32)

    return {
        "word_emb": nrm(ks[0], (VOCAB, H)),
        "pos_emb": nrm(ks[1], (MAX_POS, H)),
        "type_emb": nrm(ks[2], (TYPE_VOCAB, H)),
        "emb_ln_g": 1.0 + nrm(ks[3], (1, H)), "emb_ln_b": nrm(ks[4], (1, H)),
        "wq": nrm(ks[5], (LAYERS, H, H)), "bq": nrm(ks[6], (LAYERS, 1, H)),
        "wk": nrm(ks[7], (LAYERS, H, H)), "bk": nrm(ks[8], (LAYERS, 1, H)),
        "wv": nrm(ks[9], (LAYERS, H, H)), "bv": nrm(ks[10], (LAYERS, 1, H)),
        "wo": nrm(ks[11], (LAYERS, H, H)), "bo": nrm(ks[12], (LAYERS, 1, H)),
        "ln1_g": 1.0 + nrm(ks[13], (LAYERS, 1, H)), "ln1_b": nrm(ks[14], (LAYERS, 1, H)),
        "w1": nrm(ks[15], (LAYERS, H, FF)), "b1": nrm(ks[16], (LAYERS, 1, FF)),
        "w2": nrm(ks[17], (LAYERS, FF, H)), "b2": nrm(ks[18], (LAYERS, 1, H)),
        "ln2_g": 1.0 + nrm(ks[19], (LAYERS, 1, H)), "ln2_b": nrm(ks[20], (LAYERS, 1, H)),
    }


def pack_params(p):
    """Coalesce 22 logical params into 6 kernel operands; matmul weights in bf16."""
    emb = jnp.concatenate([p["word_emb"], p["pos_emb"], p["type_emb"],
                           p["emb_ln_g"], p["emb_ln_b"]], axis=0)      # (EMB_ROWS, H) f32
    assert emb.shape == (EMB_ROWS, H)

    wqkv = jnp.concatenate([p["wq"], p["wk"], p["wv"]], axis=-1).astype(jnp.bfloat16)

    def row(v):
        return jnp.pad(v, ((0, 0), (0, VW - v.shape[-1])))             # (1, VW)

    layers = []
    for l in range(LAYERS):
        bqkv = jnp.concatenate([p["bq"][l], p["bk"][l], p["bv"][l]], axis=-1)  # (1, 3H)
        layers.append(jnp.concatenate([
            row(bqkv), row(p["bo"][l]),
            row(p["ln1_g"][l]), row(p["ln1_b"][l]),
            row(p["b1"][l]), row(p["b2"][l]),
            row(p["ln2_g"][l]), row(p["ln2_b"][l]),
        ], axis=0))                                                     # (8, VW)
    vec = jnp.stack(layers, axis=0)                                     # (LAYERS, 8, VW) f32

    return {"emb": emb, "vec": vec, "wqkv": wqkv,
            "wo": p["wo"].astype(jnp.bfloat16),
            "w1": p["w1"].astype(jnp.bfloat16),
            "w2": p["w2"].astype(jnp.bfloat16)}


# --------------------------- pure-JAX reference --------------------------------
def reference_forward(input_ids, attention_mask, token_type_ids, p):
    we = p["word_emb"][input_ids]
    pe = p["pos_emb"][:S]
    te = p["type_emb"][token_type_ids]
    x = _layer_norm(we + pe + te, p["emb_ln_g"], p["emb_ln_b"])
    bias = ((1.0 - attention_mask.astype(jnp.float32)) * -1e9)[:, None, None, :]
    scale = 1.0 / (HD ** 0.5)
    for l in range(LAYERS):
        q = (x @ p["wq"][l] + p["bq"][l]).reshape(B, S, NH, HD)
        k = (x @ p["wk"][l] + p["bk"][l]).reshape(B, S, NH, HD)
        v = (x @ p["wv"][l] + p["bv"][l]).reshape(B, S, NH, HD)
        sc = jnp.einsum("bqhd,bkhd->bhqk", q, k) * scale + bias
        pr = jax.nn.softmax(sc, axis=-1)
        ctx = jnp.einsum("bhqk,bkhd->bqhd", pr, v).reshape(B, S, H)
        h1 = _layer_norm(x + ctx @ p["wo"][l] + p["bo"][l],
                         p["ln1_g"][l], p["ln1_b"][l])
        ff = jax.nn.gelu(h1 @ p["w1"][l] + p["b1"][l],
                         approximate=True) @ p["w2"][l] + p["b2"][l]
        x = _layer_norm(h1 + ff, p["ln2_g"][l], p["ln2_b"][l])
    return x[:, 0, :]


# --------------------------------- main ----------------------------------------
if __name__ == "__main__":
    key = jax.random.PRNGKey(0)
    pkey, ikey = jax.random.split(key)
    params = init_params(pkey)
    packed = pack_params(params)                      # weights packed & cast once

    input_ids = jax.random.randint(ikey, (B, S), 0, VOCAB, dtype=jnp.int32)
    attention_mask = jnp.array(
        [[1] * S, [1] * (S - 2) + [0, 0]], dtype=jnp.int32)   # pad last 2 of seq 2
    token_type_ids = jnp.concatenate(
        [jnp.zeros((B, S // 2), jnp.int32), jnp.ones((B, S // 2), jnp.int32)], axis=1)

    fwd = jax.jit(simcse_forward)
    out = jax.block_until_ready(fwd(input_ids, attention_mask, token_type_ids, packed))
    assert out.shape == (B, H) and out.dtype == jnp.float32

    ref = reference_forward(input_ids, attention_mask, token_type_ids, params)
    assert jnp.allclose(out, ref, rtol=5e-3, atol=5e-3), "mismatch vs reference"

    print("KERNEL_OK")
</pallas_src>

<mosaic_0001>
module attributes {stable_mosaic.version = 11 : i64} {
  func.func @simcse_kernel(%arg0: memref<16x2xi32, #tpu.memory_space<vmem>>, %arg1: memref<2x1x8xi32, #tpu.memory_space<vmem>>, %arg2: memref<84x32xf32, #tpu.memory_space<vmem>>, %arg3: memref<2x8x96xf32, #tpu.memory_space<vmem>>, %arg4: memref<2x32x96xbf16, #tpu.memory_space<vmem>>, %arg5: memref<2x32x32xbf16, #tpu.memory_space<vmem>>, %arg6: memref<2x32x64xbf16, #tpu.memory_space<vmem>>, %arg7: memref<2x64x32xbf16, #tpu.memory_space<vmem>>, %arg8: memref<2x32xf32, #tpu.memory_space<vmem>>) attributes {dimension_semantics = [], scalar_prefetch = 0 : i64, scratch_operands = 0 : i64, tpu.core_type = #tpu.core_type<tc>} {
    %c0 = arith.constant 0 : index
    %c0_0 = arith.constant 0 : index
    %0 = vector.load %arg0[%c0, %c0_0] : memref<16x2xi32, #tpu.memory_space<vmem>>, vector<16x1xi32>
    %c0_1 = arith.constant 0 : index
    %c1 = arith.constant 1 : index
    %1 = vector.load %arg0[%c0_1, %c1] : memref<16x2xi32, #tpu.memory_space<vmem>>, vector<16x1xi32>
    %2 = arith.sitofp %1 : vector<16x1xi32> to vector<16x1xf32>
    %3 = tpu.iota {dimensions = array<i32: 1>} : vector<16x64xi32>
    %4 = vector.broadcast %0 : vector<16x1xi32> to vector<16x64xi32>
    %5 = arith.cmpi eq, %4, %3 : vector<16x64xi32>
    %cst = arith.constant 1.000000e+00 : f32
    %cst_2 = arith.constant 0.000000e+00 : f32
    %6 = vector.broadcast %cst : f32 to vector<16x64xf32>
    %7 = vector.broadcast %cst_2 : f32 to vector<16x64xf32>
    %8 = arith.select %5, %6, %7 : vector<16x64xi1>, vector<16x64xf32>
    %c0_3 = arith.constant 0 : index
    %c0_4 = arith.constant 0 : index
    %9 = vector.load %arg2[%c0_3, %c0_4] : memref<84x32xf32, #tpu.memory_space<vmem>>, vector<64x32xf32>
    %cst_5 = arith.constant dense<0.000000e+00> : vector<16x32xf32>
    %10 = tpu.matmul %8, %9, %cst_5 {dimension_numbers = #tpu.dot_dimension_numbers<[1], [0], [0], [1], [0, 0, 1, 1], [], []>} : vector<16x64xf32>, vector<64x32xf32>, vector<16x32xf32> -> vector<16x32xf32>
    %c64 = arith.constant 64 : index
    %c0_6 = arith.constant 0 : index
    %11 = vector.load %arg2[%c64, %c0_6] : memref<84x32xf32, #tpu.memory_space<vmem>>, vector<8x32xf32>
    %12 = tpu.concatenate %11, %11 in 0 : vector<8x32xf32>, vector<8x32xf32> -> vector<16x32xf32>
    %c80 = arith.constant 80 : index
    %c0_7 = arith.constant 0 : index
    %13 = vector.load %arg2[%c80, %c0_7] : memref<84x32xf32, #tpu.memory_space<vmem>>, vector<1x32xf32>
    %c81 = arith.constant 81 : index
    %c0_8 = arith.constant 0 : index
    %14 = vector.load %arg2[%c81, %c0_8] : memref<84x32xf32, #tpu.memory_space<vmem>>, vector<1x32xf32>
    %15 = arith.subf %14, %13 : vector<1x32xf32>
    %16 = vector.broadcast %2 : vector<16x1xf32> to vector<16x32xf32>
    %17 = vector.broadcast %15 : vector<1x32xf32> to vector<16x32xf32>
    %18 = arith.mulf %16, %17 : vector<16x32xf32>
    %19 = vector.broadcast %13 : vector<1x32xf32> to vector<16x32xf32>
    %20 = arith.addf %19, %18 : vector<16x32xf32>
    %21 = arith.addf %10, %12 : vector<16x32xf32>
    %22 = arith.addf %21, %20 : vector<16x32xf32>
    %c82 = arith.constant 82 : index
    %c0_9 = arith.constant 0 : index
    %23 = vector.load %arg2[%c82, %c0_9] : memref<84x32xf32, #tpu.memory_space<vmem>>, vector<1x32xf32>
    %c83 = arith.constant 83 : index
    %c0_10 = arith.constant 0 : index
    %24 = vector.load %arg2[%c83, %c0_10] : memref<84x32xf32, #tpu.memory_space<vmem>>, vector<1x32xf32>
    %cst_11 = arith.constant dense<0.000000e+00> : vector<16xf32>
    %25 = vector.multi_reduction <add>, %22, %cst_11 [1] : vector<16x32xf32> to vector<16xf32>
    %26 = vector.shape_cast %25 : vector<16xf32> to vector<16x1xf32>
    %cst_12 = arith.constant 3.200000e+01 : f32
    %27 = vector.broadcast %cst_12 : f32 to vector<16x1xf32>
    %28 = arith.divf %26, %27 : vector<16x1xf32>
    %29 = vector.broadcast %28 : vector<16x1xf32> to vector<16x32xf32>
    %30 = arith.subf %22, %29 : vector<16x32xf32>
    %31 = arith.mulf %30, %30 : vector<16x32xf32>
    %cst_13 = arith.constant dense<0.000000e+00> : vector<16xf32>
    %32 = vector.multi_reduction <add>, %31, %cst_13 [1] : vector<16x32xf32> to vector<16xf32>
    %33 = vector.shape_cast %32 : vector<16xf32> to vector<16x1xf32>
    %cst_14 = arith.constant 3.200000e+01 : f32
    %34 = vector.broadcast %cst_14 : f32 to vector<16x1xf32>
    %35 = arith.divf %33, %34 : vector<16x1xf32>
    %36 = vector.broadcast %28 : vector<16x1xf32> to vector<16x32xf32>
    %37 = arith.subf %22, %36 : vector<16x32xf32>
    %cst_15 = arith.constant 9.99999996E-13 : f32
    %38 = vector.broadcast %cst_15 : f32 to vector<16x1xf32>
    %39 = arith.addf %35, %38 : vector<16x1xf32>
    %40 = math.rsqrt %39 : vector<16x1xf32>
    %41 = vector.broadcast %40 : vector<16x1xf32> to vector<16x32xf32>
    %42 = arith.mulf %37, %41 : vector<16x32xf32>
    %43 = vector.broadcast %23 : vector<1x32xf32> to vector<16x32xf32>
    %44 = arith.mulf %42, %43 : vector<16x32xf32>
    %45 = vector.broadcast %24 : vector<1x32xf32> to vector<16x32xf32>
    %46 = arith.addf %44, %45 : vector<16x32xf32>
    %c0_16 = arith.constant 0 : index
    %c0_17 = arith.constant 0 : index
    %c0_18 = arith.constant 0 : index
    %47 = vector.load %arg1[%c0_16, %c0_17, %c0_18] : memref<2x1x8xi32, #tpu.memory_space<vmem>>, vector<2x1x8xi32>
    %c0_i32 = arith.constant 0 : i32
    %48 = vector.broadcast %c0_i32 : i32 to vector<2x1x8xi32>
    %49 = arith.cmpi eq, %47, %48 : vector<2x1x8xi32>
    %cst_19 = arith.constant -1.000000e+09 : f32
    %cst_20 = arith.constant 0.000000e+00 : f32
    %50 = vector.broadcast %cst_19 : f32 to vector<2x1x8xf32>
    %51 = vector.broadcast %cst_20 : f32 to vector<2x1x8xf32>
    %52 = arith.select %49, %50, %51 : vector<2x1x8xi1>, vector<2x1x8xf32>
    %c0_21 = arith.constant 0 : index
    %c0_22 = arith.constant 0 : index
    %c0_23 = arith.constant 0 : index
    %53 = vector.load %arg3[%c0_21, %c0_22, %c0_23] : memref<2x8x96xf32, #tpu.memory_space<vmem>>, vector<1x1x96xf32>
    %54 = vector.shape_cast %53 : vector<1x1x96xf32> to vector<1x96xf32>
    %c0_24 = arith.constant 0 : index
    %c1_25 = arith.constant 1 : index
    %c0_26 = arith.constant 0 : index
    %55 = vector.load %arg3[%c0_24, %c1_25, %c0_26] : memref<2x8x96xf32, #tpu.memory_space<vmem>>, vector<1x1x32xf32>
    %56 = vector.shape_cast %55 : vector<1x1x32xf32> to vector<1x32xf32>
    %c0_27 = arith.constant 0 : index
    %c2 = arith.constant 2 : index
    %c0_28 = arith.constant 0 : index
    %57 = vector.load %arg3[%c0_27, %c2, %c0_28] : memref<2x8x96xf32, #tpu.memory_space<vmem>>, vector<1x1x32xf32>
    %58 = vector.shape_cast %57 : vector<1x1x32xf32> to vector<1x32xf32>
    %c0_29 = arith.constant 0 : index
    %c3 = arith.constant 3 : index
    %c0_30 = arith.constant 0 : index
    %59 = vector.load %arg3[%c0_29, %c3, %c0_30] : memref<2x8x96xf32, #tpu.memory_space<vmem>>, vector<1x1x32xf32>
    %60 = vector.shape_cast %59 : vector<1x1x32xf32> to vector<1x32xf32>
    %c0_31 = arith.constant 0 : index
    %c4 = arith.constant 4 : index
    %c0_32 = arith.constant 0 : index
    %61 = vector.load %arg3[%c0_31, %c4, %c0_32] : memref<2x8x96xf32, #tpu.memory_space<vmem>>, vector<1x1x64xf32>
    %62 = vector.shape_cast %61 : vector<1x1x64xf32> to vector<1x64xf32>
    %c0_33 = arith.constant 0 : index
    %c5 = arith.constant 5 : index
    %c0_34 = arith.constant 0 : index
    %63 = vector.load %arg3[%c0_33, %c5, %c0_34] : memref<2x8x96xf32, #tpu.memory_space<vmem>>, vector<1x1x32xf32>
    %64 = vector.shape_cast %63 : vector<1x1x32xf32> to vector<1x32xf32>
    %c0_35 = arith.constant 0 : index
    %c6 = arith.constant 6 : index
    %c0_36 = arith.constant 0 : index
    %65 = vector.load %arg3[%c0_35, %c6, %c0_36] : memref<2x8x96xf32, #tpu.memory_space<vmem>>, vector<1x1x32xf32>
    %66 = vector.shape_cast %65 : vector<1x1x32xf32> to vector<1x32xf32>
    %c0_37 = arith.constant 0 : index
    %c7 = arith.constant 7 : index
    %c0_38 = arith.constant 0 : index
    %67 = vector.load %arg3[%c0_37, %c7, %c0_38] : memref<2x8x96xf32, #tpu.memory_space<vmem>>, vector<1x1x32xf32>
    %68 = vector.shape_cast %67 : vector<1x1x32xf32> to vector<1x32xf32>
    %c0_39 = arith.constant 0 : index
    %c0_40 = arith.constant 0 : index
    %c0_41 = arith.constant 0 : index
    %69 = vector.load %arg4[%c0_39, %c0_40, %c0_41] : memref<2x32x96xbf16, #tpu.memory_space<vmem>>, vector<1x32x96xbf16>
    %70 = vector.shape_cast %69 : vector<1x32x96xbf16> to vector<32x96xbf16>
    %71 = arith.truncf %46 : vector<16x32xf32> to vector<16x32xbf16>
    %cst_42 = arith.constant dense<0.000000e+00> : vector<16x96xf32>
    %72 = tpu.matmul %71, %70, %cst_42 {dimension_numbers = #tpu.dot_dimension_numbers<[1], [0], [0], [1], [0, 0, 1, 1], [], []>} : vector<16x32xbf16>, vector<32x96xbf16>, vector<16x96xf32> -> vector<16x96xf32>
    %73 = vector.broadcast %54 : vector<1x96xf32> to vector<16x96xf32>
    %74 = arith.addf %72, %73 : vector<16x96xf32>
    %75 = vector.extract_strided_slice %74 {offsets = [0, 0], sizes = [16, 16], strides = [1, 1]} : vector<16x96xf32> to vector<16x16xf32>
    %76 = vector.shape_cast %75 : vector<16x16xf32> to vector<2x8x16xf32>
    %77 = arith.truncf %76 : vector<2x8x16xf32> to vector<2x8x16xbf16>
    %78 = vector.extract_strided_slice %74 {offsets = [0, 32], sizes = [16, 16], strides = [1, 1]} : vector<16x96xf32> to vector<16x16xf32>
    %79 = vector.shape_cast %78 : vector<16x16xf32> to vector<2x8x16xf32>
    %80 = arith.truncf %79 : vector<2x8x16xf32> to vector<2x8x16xbf16>
    %81 = vector.extract_strided_slice %74 {offsets = [0, 64], sizes = [16, 16], strides = [1, 1]} : vector<16x96xf32> to vector<16x16xf32>
    %82 = vector.shape_cast %81 : vector<16x16xf32> to vector<2x8x16xf32>
    %83 = arith.truncf %82 : vector<2x8x16xf32> to vector<2x8x16xbf16>
    "tpu.trace_start"() <{level = 10 : i32, message = "bqd,bkd->bqk"}> : () -> ()
    %cst_43 = arith.constant dense<0.000000e+00> : vector<2x8x8xf32>
    %84 = tpu.matmul %77, %80, %cst_43 {dimension_numbers = #tpu.dot_dimension_numbers<[2], [2], [1], [1], [0, 0, 0, 1, 1, 1], [0], [0]>} : vector<2x8x16xbf16>, vector<2x8x16xbf16>, vector<2x8x8xf32> -> vector<2x8x8xf32>
    "tpu.trace_stop"() : () -> ()
    %cst_44 = arith.constant 2.500000e-01 : f32
    %85 = vector.broadcast %cst_44 : f32 to vector<2x8x8xf32>
    %86 = arith.mulf %84, %85 : vector<2x8x8xf32>
    %87 = vector.broadcast %52 : vector<2x1x8xf32> to vector<2x8x8xf32>
    %88 = arith.addf %86, %87 : vector<2x8x8xf32>
    %cst_45 = arith.constant dense<0xFF800000> : vector<2x8xf32>
    %89 = vector.multi_reduction <maximumf>, %88, %cst_45 [2] : vector<2x8x8xf32> to vector<2x8xf32>
    %90 = vector.shape_cast %89 : vector<2x8xf32> to vector<2x8x1xf32>
    %91 = vector.broadcast %90 : vector<2x8x1xf32> to vector<2x8x8xf32>
    %92 = arith.subf %88, %91 : vector<2x8x8xf32>
    %93 = math.exp %92 : vector<2x8x8xf32>
    %cst_46 = arith.constant dense<0.000000e+00> : vector<2x8xf32>
    %94 = vector.multi_reduction <add>, %93, %cst_46 [2] : vector<2x8x8xf32> to vector<2x8xf32>
    %95 = vector.shape_cast %94 : vector<2x8xf32> to vector<2x8x1xf32>
    %96 = tpu.reciprocal %95 {approx = true} : vector<2x8x1xf32> -> vector<2x8x1xf32>
    %97 = vector.broadcast %96 : vector<2x8x1xf32> to vector<2x8x8xf32>
    %98 = arith.mulf %93, %97 : vector<2x8x8xf32>
    %99 = arith.truncf %98 : vector<2x8x8xf32> to vector<2x8x8xbf16>
    "tpu.trace_start"() <{level = 10 : i32, message = "bqk,bkd->bqd"}> : () -> ()
    %cst_47 = arith.constant dense<0.000000e+00> : vector<2x8x16xf32>
    %100 = tpu.matmul %99, %83, %cst_47 {dimension_numbers = #tpu.dot_dimension_numbers<[2], [1], [1], [2], [0, 0, 0, 1, 1, 2], [0], [0]>} : vector<2x8x8xbf16>, vector<2x8x16xbf16>, vector<2x8x16xf32> -> vector<2x8x16xf32>
    "tpu.trace_stop"() : () -> ()
    %101 = vector.shape_cast %100 : vector<2x8x16xf32> to vector<16x16xf32>
    %102 = vector.extract_strided_slice %74 {offsets = [0, 16], sizes = [16, 16], strides = [1, 1]} : vector<16x96xf32> to vector<16x16xf32>
    %103 = vector.shape_cast %102 : vector<16x16xf32> to vector<2x8x16xf32>
    %104 = arith.truncf %103 : vector<2x8x16xf32> to vector<2x8x16xbf16>
    %105 = vector.extract_strided_slice %74 {offsets = [0, 48], sizes = [16, 16], strides = [1, 1]} : vector<16x96xf32> to vector<16x16xf32>
    %106 = vector.shape_cast %105 : vector<16x16xf32> to vector<2x8x16xf32>
    %107 = arith.truncf %106 : vector<2x8x16xf32> to vector<2x8x16xbf16>
    %108 = vector.extract_strided_slice %74 {offsets = [0, 80], sizes = [16, 16], strides = [1, 1]} : vector<16x96xf32> to vector<16x16xf32>
    %109 = vector.shape_cast %108 : vector<16x16xf32> to vector<2x8x16xf32>
    %110 = arith.truncf %109 : vector<2x8x16xf32> to vector<2x8x16xbf16>
    "tpu.trace_start"() <{level = 10 : i32, message = "bqd,bkd->bqk"}> : () -> ()
    %cst_48 = arith.constant dense<0.000000e+00> : vector<2x8x8xf32>
    %111 = tpu.matmul %104, %107, %cst_48 {dimension_numbers = #tpu.dot_dimension_numbers<[2], [2], [1], [1], [0, 0, 0, 1, 1, 1], [0], [0]>} : vector<2x8x16xbf16>, vector<2x8x16xbf16>, vector<2x8x8xf32> -> vector<2x8x8xf32>
    "tpu.trace_stop"() : () -> ()
    %cst_49 = arith.constant 2.500000e-01 : f32
    %112 = vector.broadcast %cst_49 : f32 to vector<2x8x8xf32>
    %113 = arith.mulf %111, %112 : vector<2x8x8xf32>
    %114 = vector.broadcast %52 : vector<2x1x8xf32> to vector<2x8x8xf32>
    %115 = arith.addf %113, %114 : vector<2x8x8xf32>
    %cst_50 = arith.constant dense<0xFF800000> : vector<2x8xf32>
    %116 = vector.multi_reduction <maximumf>, %115, %cst_50 [2] : vector<2x8x8xf32> to vector<2x8xf32>
    %117 = vector.shape_cast %116 : vector<2x8xf32> to vector<2x8x1xf32>
    %118 = vector.broadcast %117 : vector<2x8x1xf32> to vector<2x8x8xf32>
    %119 = arith.subf %115, %118 : vector<2x8x8xf32>
    %120 = math.exp %119 : vector<2x8x8xf32>
    %cst_51 = arith.constant dense<0.000000e+00> : vector<2x8xf32>
    %121 = vector.multi_reduction <add>, %120, %cst_51 [2] : vector<2x8x8xf32> to vector<2x8xf32>
    %122 = vector.shape_cast %121 : vector<2x8xf32> to vector<2x8x1xf32>
    %123 = tpu.reciprocal %122 {approx = true} : vector<2x8x1xf32> -> vector<2x8x1xf32>
    %124 = vector.broadcast %123 : vector<2x8x1xf32> to vector<2x8x8xf32>
    %125 = arith.mulf %120, %124 : vector<2x8x8xf32>
    %126 = arith.truncf %125 : vector<2x8x8xf32> to vector<2x8x8xbf16>
    "tpu.trace_start"() <{level = 10 : i32, message = "bqk,bkd->bqd"}> : () -> ()
    %cst_52 = arith.constant dense<0.000000e+00> : vector<2x8x16xf32>
    %127 = tpu.matmul %126, %110, %cst_52 {dimension_numbers = #tpu.dot_dimension_numbers<[2], [1], [1], [2], [0, 0, 0, 1, 1, 2], [0], [0]>} : vector<2x8x8xbf16>, vector<2x8x16xbf16>, vector<2x8x16xf32> -> vector<2x8x16xf32>
    "tpu.trace_stop"() : () -> ()
    %128 = vector.shape_cast %127 : vector<2x8x16xf32> to vector<16x16xf32>
    %129 = tpu.concatenate %101, %128 in 1 : vector<16x16xf32>, vector<16x16xf32> -> vector<16x32xf32>
    %c0_53 = arith.constant 0 : index
    %c0_54 = arith.constant 0 : index
    %c0_55 = arith.constant 0 : index
    %130 = vector.load %arg5[%c0_53, %c0_54, %c0_55] : memref<2x32x32xbf16, #tpu.memory_space<vmem>>, vector<1x32x32xbf16>
    %131 = vector.shape_cast %130 : vector<1x32x32xbf16> to vector<32x32xbf16>
    %132 = arith.truncf %129 : vector<16x32xf32> to vector<16x32xbf16>
    %cst_56 = arith.constant dense<0.000000e+00> : vector<16x32xf32>
    %133 = tpu.matmul %132, %131, %cst_56 {dimension_numbers = #tpu.dot_dimension_numbers<[1], [0], [0], [1], [0, 0, 1, 1], [], []>} : vector<16x32xbf16>, vector<32x32xbf16>, vector<16x32xf32> -> vector<16x32xf32>
    %134 = vector.broadcast %56 : vector<1x32xf32> to vector<16x32xf32>
    %135 = arith.addf %133, %134 : vector<16x32xf32>
    %136 = arith.addf %46, %135 : vector<16x32xf32>
    %cst_57 = arith.constant dense<0.000000e+00> : vector<16xf32>
    %137 = vector.multi_reduction <add>, %136, %cst_57 [1] : vector<16x32xf32> to vector<16xf32>
    %138 = vector.shape_cast %137 : vector<16xf32> to vector<16x1xf32>
    %cst_58 = arith.constant 3.200000e+01 : f32
    %139 = vector.broadcast %cst_58 : f32 to vector<16x1xf32>
    %140 = arith.divf %138, %139 : vector<16x1xf32>
    %141 = vector.broadcast %140 : vector<16x1xf32> to vector<16x32xf32>
    %142 = arith.subf %136, %141 : vector<16x32xf32>
    %143 = arith.mulf %142, %142 : vector<16x32xf32>
    %cst_59 = arith.constant dense<0.000000e+00> : vector<16xf32>
    %144 = vector.multi_reduction <add>, %143, %cst_59 [1] : vector<16x32xf32> to vector<16xf32>
    %145 = vector.shape_cast %144 : vector<16xf32> to vector<16x1xf32>
    %cst_60 = arith.constant 3.200000e+01 : f32
    %146 = vector.broadcast %cst_60 : f32 to vector<16x1xf32>
    %147 = arith.divf %145, %146 : vector<16x1xf32>
    %148 = vector.broadcast %140 : vector<16x1xf32> to vector<16x32xf32>
    %149 = arith.subf %136, %148 : vector<16x32xf32>
    %cst_61 = arith.constant 9.99999996E-13 : f32
    %150 = vector.broadcast %cst_61 : f32 to vector<16x1xf32>
    %151 = arith.addf %147, %150 : vector<16x1xf32>
    %152 = math.rsqrt %151 : vector<16x1xf32>
    %153 = vector.broadcast %152 : vector<16x1xf32> to vector<16x32xf32>
    %154 = arith.mulf %149, %153 : vector<16x32xf32>
    %155 = vector.broadcast %58 : vector<1x32xf32> to vector<16x32xf32>
    %156 = arith.mulf %154, %155 : vector<16x32xf32>
    %157 = vector.broadcast %60 : vector<1x32xf32> to vector<16x32xf32>
    %158 = arith.addf %156, %157 : vector<16x32xf32>
    %c0_62 = arith.constant 0 : index
    %c0_63 = arith.constant 0 : index
    %c0_64 = arith.constant 0 : index
    %159 = vector.load %arg6[%c0_62, %c0_63, %c0_64] : memref<2x32x64xbf16, #tpu.memory_space<vmem>>, vector<1x32x64xbf16>
    %160 = vector.shape_cast %159 : vector<1x32x64xbf16> to vector<32x64xbf16>
    %161 = arith.truncf %158 : vector<16x32xf32> to vector<16x32xbf16>
    %cst_65 = arith.constant dense<0.000000e+00> : vector<16x64xf32>
    %162 = tpu.matmul %161, %160, %cst_65 {dimension_numbers = #tpu.dot_dimension_numbers<[1], [0], [0], [1], [0, 0, 1, 1], [], []>} : vector<16x32xbf16>, vector<32x64xbf16>, vector<16x64xf32> -> vector<16x64xf32>
    %163 = vector.broadcast %62 : vector<1x64xf32> to vector<16x64xf32>
    %164 = arith.addf %162, %163 : vector<16x64xf32>
    %165 = arith.mulf %164, %164 : vector<16x64xf32>
    %166 = arith.mulf %164, %165 : vector<16x64xf32>
    %cst_66 = arith.constant 4.471500e-02 : f32
    %167 = vector.broadcast %cst_66 : f32 to vector<16x64xf32>
    %168 = arith.mulf %167, %166 : vector<16x64xf32>
    %169 = arith.addf %164, %168 : vector<16x64xf32>
    %cst_67 = arith.constant 0.797884583 : f32
    %170 = vector.broadcast %cst_67 : f32 to vector<16x64xf32>
    %171 = arith.mulf %170, %169 : vector<16x64xf32>
    %172 = math.tanh %171 : vector<16x64xf32>
    %cst_68 = arith.constant 1.000000e+00 : f32
    %173 = vector.broadcast %cst_68 : f32 to vector<16x64xf32>
    %174 = arith.addf %173, %172 : vector<16x64xf32>
    %cst_69 = arith.constant 5.000000e-01 : f32
    %175 = vector.broadcast %cst_69 : f32 to vector<16x64xf32>
    %176 = arith.mulf %175, %174 : vector<16x64xf32>
    %177 = arith.mulf %164, %176 : vector<16x64xf32>
    %c0_70 = arith.constant 0 : index
    %c0_71 = arith.constant 0 : index
    %c0_72 = arith.constant 0 : index
    %178 = vector.load %arg7[%c0_70, %c0_71, %c0_72] : memref<2x64x32xbf16, #tpu.memory_space<vmem>>, vector<1x64x32xbf16>
    %179 = vector.shape_cast %178 : vector<1x64x32xbf16> to vector<64x32xbf16>
    %180 = arith.truncf %177 : vector<16x64xf32> to vector<16x64xbf16>
    %cst_73 = arith.constant dense<0.000000e+00> : vector<16x32xf32>
    %181 = tpu.matmul %180, %179, %cst_73 {dimension_numbers = #tpu.dot_dimension_numbers<[1], [0], [0], [1], [0, 0, 1, 1], [], []>} : vector<16x64xbf16>, vector<64x32xbf16>, vector<16x32xf32> -> vector<16x32xf32>
    %182 = vector.broadcast %64 : vector<1x32xf32> to vector<16x32xf32>
    %183 = arith.addf %181, %182 : vector<16x32xf32>
    %184 = arith.addf %158, %183 : vector<16x32xf32>
    %cst_74 = arith.constant dense<0.000000e+00> : vector<16xf32>
    %185 = vector.multi_reduction <add>, %184, %cst_74 [1] : vector<16x32xf32> to vector<16xf32>
    %186 = vector.shape_cast %185 : vector<16xf32> to vector<16x1xf32>
    %cst_75 = arith.constant 3.200000e+01 : f32
    %187 = vector.broadcast %cst_75 : f32 to vector<16x1xf32>
    %188 = arith.divf %186, %187 : vector<16x1xf32>
    %189 = vector.broadcast %188 : vector<16x1xf32> to vector<16x32xf32>
    %190 = arith.subf %184, %189 : vector<16x32xf32>
    %191 = arith.mulf %190, %190 : vector<16x32xf32>
    %cst_76 = arith.constant dense<0.000000e+00> : vector<16xf32>
    %192 = vector.multi_reduction <add>, %191, %cst_76 [1] : vector<16x32xf32> to vector<16xf32>
    %193 = vector.shape_cast %192 : vector<16xf32> to vector<16x1xf32>
    %cst_77 = arith.constant 3.200000e+01 : f32
    %194 = vector.broadcast %cst_77 : f32 to vector<16x1xf32>
    %195 = arith.divf %193, %194 : vector<16x1xf32>
    %196 = vector.broadcast %188 : vector<16x1xf32> to vector<16x32xf32>
    %197 = arith.subf %184, %196 : vector<16x32xf32>
    %cst_78 = arith.constant 9.99999996E-13 : f32
    %198 = vector.broadcast %cst_78 : f32 to vector<16x1xf32>
    %199 = arith.addf %195, %198 : vector<16x1xf32>
    %200 = math.rsqrt %199 : vector<16x1xf32>
    %201 = vector.broadcast %200 : vector<16x1xf32> to vector<16x32xf32>
    %202 = arith.mulf %197, %201 : vector<16x32xf32>
    %203 = vector.broadcast %66 : vector<1x32xf32> to vector<16x32xf32>
    %204 = arith.mulf %202, %203 : vector<16x32xf32>
    %205 = vector.broadcast %68 : vector<1x32xf32> to vector<16x32xf32>
    %206 = arith.addf %204, %205 : vector<16x32xf32>
    %c1_79 = arith.constant 1 : index
    %c0_80 = arith.constant 0 : index
    %c0_81 = arith.constant 0 : index
    %207 = vector.load %arg3[%c1_79, %c0_80, %c0_81] : memref<2x8x96xf32, #tpu.memory_space<vmem>>, vector<1x1x96xf32>
    %208 = vector.shape_cast %207 : vector<1x1x96xf32> to vector<1x96xf32>
    %c1_82 = arith.constant 1 : index
    %c1_83 = arith.constant 1 : index
    %c0_84 = arith.constant 0 : index
    %209 = vector.load %arg3[%c1_82, %c1_83, %c0_84] : memref<2x8x96xf32, #tpu.memory_space<vmem>>, vector<1x1x32xf32>
    %210 = vector.shape_cast %209 : vector<1x1x32xf32> to vector<1x32xf32>
    %c1_85 = arith.constant 1 : index
    %c2_86 = arith.constant 2 : index
    %c0_87 = arith.constant 0 : index
    %211 = vector.load %arg3[%c1_85, %c2_86, %c0_87] : memref<2x8x96xf32, #tpu.memory_space<vmem>>, vector<1x1x32xf32>
    %212 = vector.shape_cast %211 : vector<1x1x32xf32> to vector<1x32xf32>
    %c1_88 = arith.constant 1 : index
    %c3_89 = arith.constant 3 : index
    %c0_90 = arith.constant 0 : index
    %213 = vector.load %arg3[%c1_88, %c3_89, %c0_90] : memref<2x8x96xf32, #tpu.memory_space<vmem>>, vector<1x1x32xf32>
    %214 = vector.shape_cast %213 : vector<1x1x32xf32> to vector<1x32xf32>
    %c1_91 = arith.constant 1 : index
    %c4_92 = arith.constant 4 : index
    %c0_93 = arith.constant 0 : index
    %215 = vector.load %arg3[%c1_91, %c4_92, %c0_93] : memref<2x8x96xf32, #tpu.memory_space<vmem>>, vector<1x1x64xf32>
    %216 = vector.shape_cast %215 : vector<1x1x64xf32> to vector<1x64xf32>
    %c1_94 = arith.constant 1 : index
    %c5_95 = arith.constant 5 : index
    %c0_96 = arith.constant 0 : index
    %217 = vector.load %arg3[%c1_94, %c5_95, %c0_96] : memref<2x8x96xf32, #tpu.memory_space<vmem>>, vector<1x1x32xf32>
    %218 = vector.shape_cast %217 : vector<1x1x32xf32> to vector<1x32xf32>
    %c1_97 = arith.constant 1 : index
    %c6_98 = arith.constant 6 : index
    %c0_99 = arith.constant 0 : index
    %219 = vector.load %arg3[%c1_97, %c6_98, %c0_99] : memref<2x8x96xf32, #tpu.memory_space<vmem>>, vector<1x1x32xf32>
    %220 = vector.shape_cast %219 : vector<1x1x32xf32> to vector<1x32xf32>
    %c1_100 = arith.constant 1 : index
    %c7_101 = arith.constant 7 : index
    %c0_102 = arith.constant 0 : index
    %221 = vector.load %arg3[%c1_100, %c7_101, %c0_102] : memref<2x8x96xf32, #tpu.memory_space<vmem>>, vector<1x1x32xf32>
    %222 = vector.shape_cast %221 : vector<1x1x32xf32> to vector<1x32xf32>
    %c1_103 = arith.constant 1 : index
    %c0_104 = arith.constant 0 : index
    %c0_105 = arith.constant 0 : index
    %223 = vector.load %arg4[%c1_103, %c0_104, %c0_105] : memref<2x32x96xbf16, #tpu.memory_space<vmem>>, vector<1x32x96xbf16>
    %224 = vector.shape_cast %223 : vector<1x32x96xbf16> to vector<32x96xbf16>
    %225 = arith.truncf %206 : vector<16x32xf32> to vector<16x32xbf16>
    %cst_106 = arith.constant dense<0.000000e+00> : vector<16x96xf32>
    %226 = tpu.matmul %225, %224, %cst_106 {dimension_numbers = #tpu.dot_dimension_numbers<[1], [0], [0], [1], [0, 0, 1, 1], [], []>} : vector<16x32xbf16>, vector<32x96xbf16>, vector<16x96xf32> -> vector<16x96xf32>
    %227 = vector.broadcast %208 : vector<1x96xf32> to vector<16x96xf32>
    %228 = arith.addf %226, %227 : vector<16x96xf32>
    %229 = vector.extract_strided_slice %228 {offsets = [0, 0], sizes = [16, 16], strides = [1, 1]} : vector<16x96xf32> to vector<16x16xf32>
    %230 = vector.shape_cast %229 : vector<16x16xf32> to vector<2x8x16xf32>
    %231 = arith.truncf %230 : vector<2x8x16xf32> to vector<2x8x16xbf16>
    %232 = vector.extract_strided_slice %228 {offsets = [0, 32], sizes = [16, 16], strides = [1, 1]} : vector<16x96xf32> to vector<16x16xf32>
    %233 = vector.shape_cast %232 : vector<16x16xf32> to vector<2x8x16xf32>
    %234 = arith.truncf %233 : vector<2x8x16xf32> to vector<2x8x16xbf16>
    %235 = vector.extract_strided_slice %228 {offsets = [0, 64], sizes = [16, 16], strides = [1, 1]} : vector<16x96xf32> to vector<16x16xf32>
    %236 = vector.shape_cast %235 : vector<16x16xf32> to vector<2x8x16xf32>
    %237 = arith.truncf %236 : vector<2x8x16xf32> to vector<2x8x16xbf16>
    "tpu.trace_start"() <{level = 10 : i32, message = "bqd,bkd->bqk"}> : () -> ()
    %cst_107 = arith.constant dense<0.000000e+00> : vector<2x8x8xf32>
    %238 = tpu.matmul %231, %234, %cst_107 {dimension_numbers = #tpu.dot_dimension_numbers<[2], [2], [1], [1], [0, 0, 0, 1, 1, 1], [0], [0]>} : vector<2x8x16xbf16>, vector<2x8x16xbf16>, vector<2x8x8xf32> -> vector<2x8x8xf32>
    "tpu.trace_stop"() : () -> ()
    %cst_108 = arith.constant 2.500000e-01 : f32
    %239 = vector.broadcast %cst_108 : f32 to vector<2x8x8xf32>
    %240 = arith.mulf %238, %239 : vector<2x8x8xf32>
    %241 = vector.broadcast %52 : vector<2x1x8xf32> to vector<2x8x8xf32>
    %242 = arith.addf %240, %241 : vector<2x8x8xf32>
    %cst_109 = arith.constant dense<0xFF800000> : vector<2x8xf32>
    %243 = vector.multi_reduction <maximumf>, %242, %cst_109 [2] : vector<2x8x8xf32> to vector<2x8xf32>
    %244 = vector.shape_cast %243 : vector<2x8xf32> to vector<2x8x1xf32>
    %245 = vector.broadcast %244 : vector<2x8x1xf32> to vector<2x8x8xf32>
    %246 = arith.subf %242, %245 : vector<2x8x8xf32>
    %247 = math.exp %246 : vector<2x8x8xf32>
    %cst_110 = arith.constant dense<0.000000e+00> : vector<2x8xf32>
    %248 = vector.multi_reduction <add>, %247, %cst_110 [2] : vector<2x8x8xf32> to vector<2x8xf32>
    %249 = vector.shape_cast %248 : vector<2x8xf32> to vector<2x8x1xf32>
    %250 = tpu.reciprocal %249 {approx = true} : vector<2x8x1xf32> -> vector<2x8x1xf32>
    %251 = vector.broadcast %250 : vector<2x8x1xf32> to vector<2x8x8xf32>
    %252 = arith.mulf %247, %251 : vector<2x8x8xf32>
    %253 = arith.truncf %252 : vector<2x8x8xf32> to vector<2x8x8xbf16>
    "tpu.trace_start"() <{level = 10 : i32, message = "bqk,bkd->bqd"}> : () -> ()
    %cst_111 = arith.constant dense<0.000000e+00> : vector<2x8x16xf32>
    %254 = tpu.matmul %253, %237, %cst_111 {dimension_numbers = #tpu.dot_dimension_numbers<[2], [1], [1], [2], [0, 0, 0, 1, 1, 2], [0], [0]>} : vector<2x8x8xbf16>, vector<2x8x16xbf16>, vector<2x8x16xf32> -> vector<2x8x16xf32>
    "tpu.trace_stop"() : () -> ()
    %255 = vector.shape_cast %254 : vector<2x8x16xf32> to vector<16x16xf32>
    %256 = vector.extract_strided_slice %228 {offsets = [0, 16], sizes = [16, 16], strides = [1, 1]} : vector<16x96xf32> to vector<16x16xf32>
    %257 = vector.shape_cast %256 : vector<16x16xf32> to vector<2x8x16xf32>
    %258 = arith.truncf %257 : vector<2x8x16xf32> to vector<2x8x16xbf16>
    %259 = vector.extract_strided_slice %228 {offsets = [0, 48], sizes = [16, 16], strides = [1, 1]} : vector<16x96xf32> to vector<16x16xf32>
    %260 = vector.shape_cast %259 : vector<16x16xf32> to vector<2x8x16xf32>
    %261 = arith.truncf %260 : vector<2x8x16xf32> to vector<2x8x16xbf16>
    %262 = vector.extract_strided_slice %228 {offsets = [0, 80], sizes = [16, 16], strides = [1, 1]} : vector<16x96xf32> to vector<16x16xf32>
    %263 = vector.shape_cast %262 : vector<16x16xf32> to vector<2x8x16xf32>
    %264 = arith.truncf %263 : vector<2x8x16xf32> to vector<2x8x16xbf16>
    "tpu.trace_start"() <{level = 10 : i32, message = "bqd,bkd->bqk"}> : () -> ()
    %cst_112 = arith.constant dense<0.000000e+00> : vector<2x8x8xf32>
    %265 = tpu.matmul %258, %261, %cst_112 {dimension_numbers = #tpu.dot_dimension_numbers<[2], [2], [1], [1], [0, 0, 0, 1, 1, 1], [0], [0]>} : vector<2x8x16xbf16>, vector<2x8x16xbf16>, vector<2x8x8xf32> -> vector<2x8x8xf32>
    "tpu.trace_stop"() : () -> ()
    %cst_113 = arith.constant 2.500000e-01 : f32
    %266 = vector.broadcast %cst_113 : f32 to vector<2x8x8xf32>
    %267 = arith.mulf %265, %266 : vector<2x8x8xf32>
    %268 = vector.broadcast %52 : vector<2x1x8xf32> to vector<2x8x8xf32>
    %269 = arith.addf %267, %268 : vector<2x8x8xf32>
    %cst_114 = arith.constant dense<0xFF800000> : vector<2x8xf32>
    %270 = vector.multi_reduction <maximumf>, %269, %cst_114 [2] : vector<2x8x8xf32> to vector<2x8xf32>
    %271 = vector.shape_cast %270 : vector<2x8xf32> to vector<2x8x1xf32>
    %272 = vector.broadcast %271 : vector<2x8x1xf32> to vector<2x8x8xf32>
    %273 = arith.subf %269, %272 : vector<2x8x8xf32>
    %274 = math.exp %273 : vector<2x8x8xf32>
    %cst_115 = arith.constant dense<0.000000e+00> : vector<2x8xf32>
    %275 = vector.multi_reduction <add>, %274, %cst_115 [2] : vector<2x8x8xf32> to vector<2x8xf32>
    %276 = vector.shape_cast %275 : vector<2x8xf32> to vector<2x8x1xf32>
    %277 = tpu.reciprocal %276 {approx = true} : vector<2x8x1xf32> -> vector<2x8x1xf32>
    %278 = vector.broadcast %277 : vector<2x8x1xf32> to vector<2x8x8xf32>
    %279 = arith.mulf %274, %278 : vector<2x8x8xf32>
    %280 = arith.truncf %279 : vector<2x8x8xf32> to vector<2x8x8xbf16>
    "tpu.trace_start"() <{level = 10 : i32, message = "bqk,bkd->bqd"}> : () -> ()
    %cst_116 = arith.constant dense<0.000000e+00> : vector<2x8x16xf32>
    %281 = tpu.matmul %280, %264, %cst_116 {dimension_numbers = #tpu.dot_dimension_numbers<[2], [1], [1], [2], [0, 0, 0, 1, 1, 2], [0], [0]>} : vector<2x8x8xbf16>, vector<2x8x16xbf16>, vector<2x8x16xf32> -> vector<2x8x16xf32>
    "tpu.trace_stop"() : () -> ()
    %282 = vector.shape_cast %281 : vector<2x8x16xf32> to vector<16x16xf32>
    %283 = tpu.concatenate %255, %282 in 1 : vector<16x16xf32>, vector<16x16xf32> -> vector<16x32xf32>
    %c1_117 = arith.constant 1 : index
    %c0_118 = arith.constant 0 : index
    %c0_119 = arith.constant 0 : index
    %284 = vector.load %arg5[%c1_117, %c0_118, %c0_119] : memref<2x32x32xbf16, #tpu.memory_space<vmem>>, vector<1x32x32xbf16>
    %285 = vector.shape_cast %284 : vector<1x32x32xbf16> to vector<32x32xbf16>
    %286 = arith.truncf %283 : vector<16x32xf32> to vector<16x32xbf16>
    %cst_120 = arith.constant dense<0.000000e+00> : vector<16x32xf32>
    %287 = tpu.matmul %286, %285, %cst_120 {dimension_numbers = #tpu.dot_dimension_numbers<[1], [0], [0], [1], [0, 0, 1, 1], [], []>} : vector<16x32xbf16>, vector<32x32xbf16>, vector<16x32xf32> -> vector<16x32xf32>
    %288 = vector.broadcast %210 : vector<1x32xf32> to vector<16x32xf32>
    %289 = arith.addf %287, %288 : vector<16x32xf32>
    %290 = arith.addf %206, %289 : vector<16x32xf32>
    %cst_121 = arith.constant dense<0.000000e+00> : vector<16xf32>
    %291 = vector.multi_reduction <add>, %290, %cst_121 [1] : vector<16x32xf32> to vector<16xf32>
    %292 = vector.shape_cast %291 : vector<16xf32> to vector<16x1xf32>
    %cst_122 = arith.constant 3.200000e+01 : f32
    %293 = vector.broadcast %cst_122 : f32 to vector<16x1xf32>
    %294 = arith.divf %292, %293 : vector<16x1xf32>
    %295 = vector.broadcast %294 : vector<16x1xf32> to vector<16x32xf32>
    %296 = arith.subf %290, %295 : vector<16x32xf32>
    %297 = arith.mulf %296, %296 : vector<16x32xf32>
    %cst_123 = arith.constant dense<0.000000e+00> : vector<16xf32>
    %298 = vector.multi_reduction <add>, %297, %cst_123 [1] : vector<16x32xf32> to vector<16xf32>
    %299 = vector.shape_cast %298 : vector<16xf32> to vector<16x1xf32>
    %cst_124 = arith.constant 3.200000e+01 : f32
    %300 = vector.broadcast %cst_124 : f32 to vector<16x1xf32>
    %301 = arith.divf %299, %300 : vector<16x1xf32>
    %302 = vector.broadcast %294 : vector<16x1xf32> to vector<16x32xf32>
    %303 = arith.subf %290, %302 : vector<16x32xf32>
    %cst_125 = arith.constant 9.99999996E-13 : f32
    %304 = vector.broadcast %cst_125 : f32 to vector<16x1xf32>
    %305 = arith.addf %301, %304 : vector<16x1xf32>
    %306 = math.rsqrt %305 : vector<16x1xf32>
    %307 = vector.broadcast %306 : vector<16x1xf32> to vector<16x32xf32>
    %308 = arith.mulf %303, %307 : vector<16x32xf32>
    %309 = vector.broadcast %212 : vector<1x32xf32> to vector<16x32xf32>
    %310 = arith.mulf %308, %309 : vector<16x32xf32>
    %311 = vector.broadcast %214 : vector<1x32xf32> to vector<16x32xf32>
    %312 = arith.addf %310, %311 : vector<16x32xf32>
    %c1_126 = arith.constant 1 : index
    %c0_127 = arith.constant 0 : index
    %c0_128 = arith.constant 0 : index
    %313 = vector.load %arg6[%c1_126, %c0_127, %c0_128] : memref<2x32x64xbf16, #tpu.memory_space<vmem>>, vector<1x32x64xbf16>
    %314 = vector.shape_cast %313 : vector<1x32x64xbf16> to vector<32x64xbf16>
    %315 = arith.truncf %312 : vector<16x32xf32> to vector<16x32xbf16>
    %cst_129 = arith.constant dense<0.000000e+00> : vector<16x64xf32>
    %316 = tpu.matmul %315, %314, %cst_129 {dimension_numbers = #tpu.dot_dimension_numbers<[1], [0], [0], [1], [0, 0, 1, 1], [], []>} : vector<16x32xbf16>, vector<32x64xbf16>, vector<16x64xf32> -> vector<16x64xf32>
    %317 = vector.broadcast %216 : vector<1x64xf32> to vector<16x64xf32>
    %318 = arith.addf %316, %317 : vector<16x64xf32>
    %319 = arith.mulf %318, %318 : vector<16x64xf32>
    %320 = arith.mulf %318, %319 : vector<16x64xf32>
    %cst_130 = arith.constant 4.471500e-02 : f32
    %321 = vector.broadcast %cst_130 : f32 to vector<16x64xf32>
    %322 = arith.mulf %321, %320 : vector<16x64xf32>
    %323 = arith.addf %318, %322 : vector<16x64xf32>
    %cst_131 = arith.constant 0.797884583 : f32
    %324 = vector.broadcast %cst_131 : f32 to vector<16x64xf32>
    %325 = arith.mulf %324, %323 : vector<16x64xf32>
    %326 = math.tanh %325 : vector<16x64xf32>
    %cst_132 = arith.constant 1.000000e+00 : f32
    %327 = vector.broadcast %cst_132 : f32 to vector<16x64xf32>
    %328 = arith.addf %327, %326 : vector<16x64xf32>
    %cst_133 = arith.constant 5.000000e-01 : f32
    %329 = vector.broadcast %cst_133 : f32 to vector<16x64xf32>
    %330 = arith.mulf %329, %328 : vector<16x64xf32>
    %331 = arith.mulf %318, %330 : vector<16x64xf32>
    %c1_134 = arith.constant 1 : index
    %c0_135 = arith.constant 0 : index
    %c0_136 = arith.constant 0 : index
    %332 = vector.load %arg7[%c1_134, %c0_135, %c0_136] : memref<2x64x32xbf16, #tpu.memory_space<vmem>>, vector<1x64x32xbf16>
    %333 = vector.shape_cast %332 : vector<1x64x32xbf16> to vector<64x32xbf16>
    %334 = arith.truncf %331 : vector<16x64xf32> to vector<16x64xbf16>
    %cst_137 = arith.constant dense<0.000000e+00> : vector<16x32xf32>
    %335 = tpu.matmul %334, %333, %cst_137 {dimension_numbers = #tpu.dot_dimension_numbers<[1], [0], [0], [1], [0, 0, 1, 1], [], []>} : vector<16x64xbf16>, vector<64x32xbf16>, vector<16x32xf32> -> vector<16x32xf32>
    %336 = vector.broadcast %218 : vector<1x32xf32> to vector<16x32xf32>
    %337 = arith.addf %335, %336 : vector<16x32xf32>
    %338 = arith.addf %312, %337 : vector<16x32xf32>
    %cst_138 = arith.constant dense<0.000000e+00> : vector<16xf32>
    %339 = vector.multi_reduction <add>, %338, %cst_138 [1] : vector<16x32xf32> to vector<16xf32>
    %340 = vector.shape_cast %339 : vector<16xf32> to vector<16x1xf32>
    %cst_139 = arith.constant 3.200000e+01 : f32
    %341 = vector.broadcast %cst_139 : f32 to vector<16x1xf32>
    %342 = arith.divf %340, %341 : vector<16x1xf32>
    %343 = vector.broadcast %342 : vector<16x1xf32> to vector<16x32xf32>
    %344 = arith.subf %338, %343 : vector<16x32xf32>
    %345 = arith.mulf %344, %344 : vector<16x32xf32>
    %cst_140 = arith.constant dense<0.000000e+00> : vector<16xf32>
    %346 = vector.multi_reduction <add>, %345, %cst_140 [1] : vector<16x32xf32> to vector<16xf32>
    %347 = vector.shape_cast %346 : vector<16xf32> to vector<16x1xf32>
    %cst_141 = arith.constant 3.200000e+01 : f32
    %348 = vector.broadcast %cst_141 : f32 to vector<16x1xf32>
    %349 = arith.divf %347, %348 : vector<16x1xf32>
    %350 = vector.broadcast %342 : vector<16x1xf32> to vector<16x32xf32>
    %351 = arith.subf %338, %350 : vector<16x32xf32>
    %cst_142 = arith.constant 9.99999996E-13 : f32
    %352 = vector.broadcast %cst_142 : f32 to vector<16x1xf32>
    %353 = arith.addf %349, %352 : vector<16x1xf32>
    %354 = math.rsqrt %353 : vector<16x1xf32>
    %355 = vector.broadcast %354 : vector<16x1xf32> to vector<16x32xf32>
    %356 = arith.mulf %351, %355 : vector<16x32xf32>
    %357 = vector.broadcast %220 : vector<1x32xf32> to vector<16x32xf32>
    %358 = arith.mulf %356, %357 : vector<16x32xf32>
    %359 = vector.broadcast %222 : vector<1x32xf32> to vector<16x32xf32>
    %360 = arith.addf %358, %359 : vector<16x32xf32>
    %361 = vector.extract_strided_slice %360 {offsets = [0, 0], sizes = [1, 32], strides = [1, 1]} : vector<16x32xf32> to vector<1x32xf32>
    %362 = vector.extract_strided_slice %360 {offsets = [8, 0], sizes = [1, 32], strides = [1, 1]} : vector<16x32xf32> to vector<1x32xf32>
    %363 = tpu.concatenate %361, %362 in 0 : vector<1x32xf32>, vector<1x32xf32> -> vector<2x32xf32>
    %c0_143 = arith.constant 0 : index
    %c0_144 = arith.constant 0 : index
    %364 = vector.load %arg8[%c0_143, %c0_144] : memref<2x32xf32, #tpu.memory_space<vmem>>, vector<2x32xf32>
    tpu.vector_store %arg8[%c0_143, %c0_144], %363 {strides = array<i32>} : memref<2x32xf32, #tpu.memory_space<vmem>>, vector<2x32xf32>,
    return
  }
}

</mosaic_0001>

<bundles_post_ra>
// kernel: simcse_forward.1
= control target key start
LH: loop header
LB: loop body
LE: loop exit
PB: predicated region body
PF: predicated region fallthrough
CT: control target
= control target key end

     0   :  { %v2427_v2 = vmov 0   ;;  %v2428_v11 = vmov 0.0   ;;  %v2429_v16 = vmov 1   ;;  %s2924_s0 = inlined_call_operand.vmem [shape: s32[16,2], index: 0, kind: input, shape index: {}]   ;;  %s2925_s1 = inlined_call_operand.vmem [shape: s32[2,1,8], index: 1, kind: input, shape index: {}]   ;;  %s2926_s2 = inlined_call_operand.vmem [shape: f32[84,32], index: 2, kind: input, shape index: {}]   ;;  %s2927_s3 = inlined_call_operand.vmem [shape: f32[2,8,96], index: 3, kind: input, shape index: {}]   ;;  %s2928_s4 = inlined_call_operand.vmem [shape: bf16[2,32,96], index: 4, kind: input, shape index: {}]   ;;  %s2929_s5 = inlined_call_operand.vmem [shape: bf16[2,32,32], index: 5, kind: input, shape index: {}]   ;;  %s2930_s6 = inlined_call_operand.vmem [shape: bf16[2,32,64], index: 6, kind: input, shape index: {}]   ;;  %s2931_s7 = inlined_call_operand.vmem [shape: bf16[2,64,32], index: 7, kind: input, shape index: {}]   ;;  %s2932_s8 = inlined_call_operand.hbm [shape: f32[2,32], index: 8, kind: output, shape index: {}]  }
   0x1   :  { %v31_v0 = vld [vmem:[%s2924_s0] sm:$0xff]  ;;  %2310 = vset.pattern.permute.xlu0 %v2427_v2  ;;  %v48_v3 = vld [vmem:[%s2926_s2 + $0x8] sm:$0xff]  ;;  %v49_v4 = vld [vmem:[%s2926_s2 + $0x10] sm:$0xff]  ;;  %2115 = vmatprep.subr.bf16.mxu1 %v2428_v11 }
   0x2   :  { %v47_v1 = vld [vmem:[%s2926_s2] sm:$0xff]  ;;  %v50_v5 = vld [vmem:[%s2926_s2 + $0x18] sm:$0xff]  ;;  %38 = vperm.xlu0 %2310, %v31_v0   ;;  %v32_v6 = vld [vmem:[%s2924_s0 + $0x8] sm:$0xff]  ;;  %v33_v15 = vcvt.s32.f32 %v31_v0  ;;  %2311 = vset.pattern.permute.xlu1 %v2429_v16 }
   0x3   :  { %v2283_v7 = vpack.c.bf16 %v48_v3, %v47_v1  ;;  %v2287_v8 = vpack.c.bf16 %v50_v5, %v49_v4  ;;  %v51_v9 = vld [vmem:[%s2926_s2 + $0x20] sm:$0xff]  ;;  %v52_v10 = vld [vmem:[%s2926_s2 + $0x28] sm:$0xff]  ;;  %v53_v12 = vld [vmem:[%s2926_s2 + $0x30] sm:$0xff]  ;;  %v34_v17 = vcvt.s32.f32 %v32_v6 }
   0x4   :  { %v54_v13 = vld [vmem:[%s2926_s2 + $0x38] sm:$0xff]  ;;  %v2291_v14 = vpack.c.bf16 %v52_v10, %v51_v9  ;;  %61 = vperm.xlu1 %2311, %v33_v15  }
   0x5   :  { %2284 = vmatprep.subr.bf16.mxu0 %v2283_v7  ;;  %v2295_v18 = vpack.c.bf16 %v54_v13, %v53_v12 }
   0x6   :  { %2286 = vmatpush3.bf16.msra.mxu0 %v2283_v7  ;;  %41 = vperm.xlu0 %2310, %v32_v6  }
   0x7   :  { %2288 = vmatprep.subr.bf16.mxu0 %v2287_v8 }
   0x8   :  { %66 = vperm.xlu1 %2311, %v34_v17  }
   0xa   :  { %2290 = vmatpush3.bf16.msra.mxu0 %v2287_v8  ;;  %2322 = vset.pattern.permute.xlu0 %v2429_v16 }
   0xb   :  { %2292 = vmatprep.subr.bf16.mxu0 %v2291_v14 }
   0xe   :  { %2294 = vmatpush3.bf16.msra.mxu0 %v2291_v14 }
   0xf   :  { %2296 = vmatprep.subr.bf16.mxu0 %v2295_v18 }
  0x12   :  { %2298 = vmatpush3.bf16.msra.mxu0 %v2295_v18 }
  0x13   :  { %2141 = vmatprep.subr.bf16.mxu0 %v2428_v11 }
  0x14   :  { %13 = vsyncpa [#allocation3], 0  ;;  %v35_v19 = vlaneseq  ;;  %vm81_vm0 = vcmask 523264   ;;  %v56_v26 = vld [vmem:[%s2926_s2 + $0x50] sm:$0x1]  ;;  %v55_v36 = vld [vmem:[%s2926_s2 + $0x40] sm:$0xff] }
  0x15   :  { %v57_v27 = vld [vmem:[%s2926_s2 + $0x51] sm:$0x1]  ;;  %vm167_vm3 = vcmask 261120   ;;  %v2323_v57 = vld [vmem:[%s2928_s4] sm:$0xff]   ;;  %v2324_v58 = vld [vmem:[%s2928_s4 + $0x8] sm:$0xff]   ;;  %vm2430_vm4 = vmmov 0  }
  0x16   :  { %v36_v20 = vand.u32 127, %v35_v19  ;;  %v70_v25 = vshrl.u32 %v35_v19, 7  ;;  %v58_v30 = vsub.f32 %v57_v27, %v56_v26  ;;  %2116 = vmatpush3.bf16.msra.mxu1 %v2323_v57  ;;  %2119 = vmatprep.mubr.msk.bf16.mxu1 %vm2430_vm4, %v2428_v11  ;;  %v1936_v3 = vld [vmem:[%s2926_s2 + $0x52] ss:$0 sm:$0xff]  ;;  %v1937_v7 = vld [vmem:[%s2926_s2 + $0x53] ss:$0 sm:$0xff] }
  0x17   :  { %2117 = vmatprep.subr.bf16.mxu1 %v2428_v11  ;;  %v1938_v13 = vld [vmem:[%s2927_s3] ss:$0 sm:$0xff]  ;;  %s2431_s2 = smov 96   ;;  %vm291_vm5 = vcmask 130048   ;;  %vm403_vm8 = vcmask 64512   ;;  %vm433_vm9 = vcmask 1043456  }
  0x18   :  { %v2525_v29 = vsub.s32 0, %v70_v25  ;;  %s2433_s22 = smov 80   ;;  %s2434_s0 = smov 112   ;;  %vm1916_vm10 = vcmask 1040384   ;;  %vm1918_vm11 = vcmask 254976  }
  0x19   :  { %s2435_s23 = smov 48   ;;  %s2436_s28 = smov 16  }
  0x1a   :  { %v72_v31 = vrot.slane %v58_v30, %v2525_v29  ;;  %v78_v33 = vrot.slane %v56_v26, %v2525_v29  ;;  %2118 = vmatpush3.bf16.msra.mxu1 %v2324_v58  ;;  %v207_v26 = vld [vmem:[%s2925_s1] sm:$0x1] }
  0x1b   :  { %2123 = vmatprep.subr.bf16.mxu1 %v2428_v11  ;;  %vm209_vm6 = vcmp.eq.s32.totalorder %v207_v26, 0 }
  0x1c   :  { %v211_v27 = vsel %vm209_vm6, -1e+09, %v2428_v11 }
  0x1d   :  { %v2594_v30 = vrot.slane %v211_v27, %v2525_v29 }
  0x81   :  { %v39_v21 = vpop.permute.xlu0 %38 }
  0x82   :  { %vm43_vm1 = vcmp.eq.s32.totalorder %v39_v21, %v36_v20 }
  0x83   :  { %v45_v22 = vsel %vm43_vm1, 1.0, %v2428_v11  ;;  %v62_v28 = vpop.permute.xlu1 %61 }
  0x84   :  { %2112 = vmatprep.mubr.msk.f32.mxu0 %vm81_vm0, %v45_v22  ;;  %v73_v35 = vmul.f32 %v72_v31, %v62_v28  ;;  %v208_v28 = vld [vmem:[%s2925_s1 + $0x1] sm:$0x1]  ;;  %s2432_s1 = smov 64  }
  0x85   :  { %v42_v23 = vpop.permute.xlu0 %41  ;;  %vm210_vm7 = vcmp.eq.s32.totalorder %v208_v28, 0 }
  0x86   :  { %vm44_vm2 = vcmp.eq.s32.totalorder %v42_v23, %v36_v20  ;;  %v79_v38 = vadd.f32 %v78_v33, %v73_v35 }
  0x87   :  { %v46_v24 = vsel %vm44_vm2, 1.0, %v2428_v11  ;;  %v67_v32 = vpop.permute.xlu1 %66 }
  0x88   :  { %2113 = vmatmul.mubr.msk.f32.vlgmr.msra.gmra.mrb[0].mxu0 %vm81_vm0, %v46_v24  ;;  %v74_v34 = vmul.f32 %v72_v31, %v67_v32 }
  0x89   :  { %2143 = vmatprep.mubr.msk.bf16.mxu0 %vm2430_vm4, %v2428_v11 }
  0x8a   :  { %v80_v37 = vadd.f32 %v78_v33, %v74_v34 }
 0x15b   :  { %v2114_v39 = vpop.f32.mrb[0].mxu0 }
 0x15c   :  { %v160_v40 = vadd.f32 %v2114_v39, %v55_v36  ;;  %v154_v41 = vpop.f32.mrb[1].mxu0 }
 0x15d   :  { %v155_v42 = vadd.f32 %v154_v41, %v55_v36 }
 0x15e   :  { %v164_v43 = vadd.f32 %v160_v40, %v80_v37  ;;  %v212_v37 = vsel %vm210_vm7, -1e+09, %v2428_v11 }
 0x15f   :  { %v163_v44 = vadd.f32 %v155_v42, %v79_v38  ;;  %v2600_v39 = vrot.slane %v212_v37, %v2525_v29 }
 0x160   :  { %v171_v45 = vsel %vm167_vm3, %v164_v43, 0.0 }
 0x161   :  { %172 = vadd.xlane.f32.xlu1 %v171_v45  ;;  %v168_v46 = vsel %vm167_vm3, %v163_v44, 0.0 }
 0x162   :  { %169 = vadd.xlane.f32.xlu0 %v168_v46 }
 0x1ee   :  { %v173_v47 = vpop.xlane.xlu1 %172 }
 0x1ef   :  { %v176_v48 = vmul.f32 0.03125, %v173_v47  ;;  %v170_v49 = vpop.xlane.xlu0 %169 }
 0x1f0   :  { %v175_v50 = vmul.f32 0.03125, %v170_v49 }
 0x1f1   :  { %v178_v51 = vsub.f32 %v164_v43, %v176_v48 }
 0x1f2   :  { %v177_v52 = vsub.f32 %v163_v44, %v175_v50 }
 0x1f3   :  { %v180_v55 = vmul.f32 %v178_v51, %v178_v51 }
 0x1f4   :  { %v179_v53 = vmul.f32 %v177_v52, %v177_v52 }
 0x1f5   :  { %v184_v56 = vsel %vm167_vm3, %v180_v55, 0.0 }
 0x1f6   :  { %v181_v54 = vsel %vm167_vm3, %v179_v53, 0.0 }
 0x1f7   :  { %182 = vadd.xlane.f32.xlu0 %v181_v54 }
 0x1fb   :  { %185 = vadd.xlane.f32.xlu0 %v184_v56 }
 0x284   :  { %v183_v59 = vpop.xlane.xlu0 %182 }
 0x285   :  { %v187_v60 = vmul.f32 0.03125, %v183_v59 }
 0x287   :  { %v189_v61 = vadd.f32 1e-12, %v187_v60 }
 0x288   :  { %v186_v62 = vpop.xlane.xlu0 %185 }
 0x289   :  { %2343 = vrsqrt.f32 %v189_v61  ;;  %v188_v63 = vmul.f32 0.03125, %v186_v62 }
 0x28b   :  { %v190_v0 = vadd.f32 1e-12, %v188_v63 }
 0x28d   :  { %2345 = vrsqrt.f32 %v190_v0 }
 0x293   :  { %v2344_v1 = vpop.eup %2343 }
 0x294   :  { %v193_v2 = vmul.f32 %v2344_v1, %v177_v52 }
 0x296   :  { %v199_v6 = vmul.f32 %v1936_v3, %v193_v2 }
 0x297   :  { %v2346_v4 = vpop.eup %2345 }
 0x298   :  { %v194_v5 = vmul.f32 %v2346_v4, %v178_v51  ;;  %v2554_v9 = vadd.f32 %v1937_v7, %v199_v6 }
 0x29a   :  { %v200_v8 = vmul.f32 %v1936_v3, %v194_v5 }
 0x29c   :  { %v2556_v10 = vadd.f32 %v1937_v7, %v200_v8 }
 0x29e   :  { %v225_v12 = vpack.c.bf16 %v2556_v10, %v2554_v9 }
 0x2a0   :  { %2120 = vmatmul.mubr.msk.bf16.vlgmr.msra.gmra.mrb[0].mxu1 %vm167_vm3, %v225_v12 }
 0x2a1   :  { %2125 = vmatprep.mubr.msk.bf16.mxu1 %vm2430_vm4, %v2428_v11 }
 0x373   :  { %v279_v14 = vpop.f32.mrb[0].mxu1 }
 0x374   :  { %v280_v15 = vadd.f32 %v1938_v13, %v279_v14  ;;  %v2121_v16 = vpop.f32.mrb[1].mxu1 }
 0x375   :  { %v282_v17 = vpop.f32.mrb[2].mxu1 }
 0x376   :  { %v2566_v18 = vpack.c.bf16 %v280_v15, %v280_v15  ;;  %v283_v19 = vadd.f32 %v1938_v13, %v282_v17  ;;  %v2122_v20 = vpop.f32.mrb[3].mxu1 }
 0x378   :  { %v2568_v21 = vpack.c.bf16 %v283_v19, %v283_v19  ;;  %289 = vrot.lane.b32.xlu1 %v2566_v18, %s2431_s2 }
 0x37a   :  { %339 = vrot.lane.b32.xlu0 %v2568_v21, %s2431_s2 }
 0x3ea   :  { %v290_v22 = vpop.permute.xlu1 %289 }
 0x3eb   :  { %v296_v23 = vsel %vm291_vm5, %v290_v22, 0 }
 0x3ec   :  { %2124 = vmatpush3.bf16.xpose.msra.mxu1 %v296_v23  ;;  %v340_v24 = vpop.permute.xlu0 %339 }
 0x3ed   :  { %2129 = vmatprep.subr.bf16.mxu1 %v2428_v11  ;;  %v345_v25 = vsel %vm291_vm5, %v340_v24, 0 }
 0x3f3   :  { %2126 = vmatmul.mubr.msk.bf16.vlgmr.msra.gmra.mrb[4].mxu1 %vm291_vm5, %v2566_v18 }
 0x3f4   :  { %2130 = vmatpush3.bf16.xpose.msra.mxu1 %v345_v25  ;;  %2131 = vmatprep.mubr.msk.bf16.mxu1 %vm2430_vm4, %v2428_v11 }
 0x3f5   :  { %2135 = vmatprep.subr.bf16.mxu1 %v2428_v11 }
 0x3fb   :  { %2132 = vmatmul.mubr.msk.bf16.vlgmr.msra.gmra.mrb[8].mxu1 %vm291_vm5, %v2568_v21 }
 0x3fc   :  { %2137 = vmatprep.mubr.msk.bf16.mxu1 %vm2430_vm4, %v2428_v11 }
 0x4c6   :  { %v332_v31 = vpop.f32.mrb[4].mxu1 }
 0x4c7   :  { %v387_v32 = vmul.f32 0.25, %v332_v31  ;;  %v2127_v33 = vpop.f32.mrb[5].mxu1 }
 0x4c8   :  { %v335_v34 = vpop.f32.mrb[6].mxu1 }
 0x4c9   :  { %v2128_v35 = vpop.f32.mrb[7].mxu1  ;;  %v401_v36 = vadd.f32 %v2594_v30, %v387_v32 }
 0x4cb   :  { %v404_v38 = vsel %vm403_vm8, %v401_v36, -inf }
 0x4cc   :  { %405 = vmax.xlane.f32.xlu1 %v404_v38 }
 0x4ce   :  { %v381_v40 = vpop.f32.mrb[8].mxu1 }
 0x4cf   :  { %v388_v41 = vmul.f32 0.25, %v381_v40  ;;  %v2133_v42 = vpop.f32.mrb[9].mxu1 }
 0x4d0   :  { %v384_v43 = vpop.f32.mrb[10].mxu1 }
 0x4d1   :  { %v2134_v44 = vpop.f32.mrb[11].mxu1  ;;  %v402_v45 = vadd.f32 %v2600_v39, %v388_v41 }
 0x4d3   :  { %v407_v46 = vsel %vm403_vm8, %v402_v45, -inf }
 0x4d4   :  { %408 = vmax.xlane.f32.xlu0 %v407_v46 }
 0x4dd   :  { %428 = vrot.lane.b32.xlu1 %v2566_v18, %s2432_s1 }
 0x559   :  { %v406_v47 = vpop.xlane.xlu1 %405 }
 0x55a   :  { %v410_v48 = vsub.f32 %v401_v36, %v406_v47 }
 0x55c   :  { %v412_v49 = vmul.f32 1.442695, %v410_v48 }
 0x55d   :  { %v429_v29 = vpop.permute.xlu1 %428 }
 0x55e   :  { %2347 = vpow2.f32 %v412_v49  ;;  %v435_v50 = vsel %vm433_vm9, %v429_v29, 0 }
 0x55f   :  { %2136 = vmatpush3.bf16.msra.mxu1 %v435_v50 }
 0x560   :  { %2147 = vmatprep.subr.bf16.mxu1 %v2428_v11 }
 0x561   :  { %v409_v51 = vpop.xlane.xlu0 %408 }
 0x562   :  { %v411_v52 = vsub.f32 %v402_v45, %v409_v51 }
 0x564   :  { %v414_v53 = vmul.f32 1.442695, %v411_v52 }
 0x566   :  { %2349 = vpow2.f32 %v414_v53 }
 0x568   :  { %v2348_v54 = vpop.eup %2347 }
 0x569   :  { %v416_v55 = vsel %vm403_vm8, %v2348_v54, 0.0 }
 0x56a   :  { %417 = vadd.xlane.f32.xlu1 %v416_v55 }
 0x570   :  { %v2350_v56 = vpop.eup %2349 }
 0x571   :  { %v419_v57 = vsel %vm403_vm8, %v2350_v56, 0.0 }
 0x572   :  { %420 = vadd.xlane.f32.xlu0 %v419_v57 }
 0x57b   :  { %527 = vrot.lane.b32.xlu1 %v2566_v18, %s2433_s22 }
 0x57f   :  { %577 = vrot.lane.b32.xlu1 %v2568_v21, %s2433_s22 }
 0x583   :  { %575 = vrot.lane.b32.xlu1 %v2568_v21, %s2434_s0 }
 0x588   :  { %477 = vrot.lane.b32.xlu0 %v2568_v21, %s2432_s1 }
 0x58c   :  { %525 = vrot.lane.b32.xlu0 %v2566_v18, %s2434_s0 }
 0x5f7   :  { %v418_v58 = vpop.xlane.xlu1 %417 }
 0x5f8   :  { %2351 = vrcp.f32 %v418_v58 }
 0x5fb   :  { %v528_v63 = vpop.permute.xlu1 %527 }
 0x5fc   :  { %v533_v2 = vsel %vm291_vm5, %v528_v63, 0 }
 0x5ff   :  { %v421_v59 = vpop.xlane.xlu0 %420  ;;  %v578_v5 = vpop.permute.xlu1 %577 }
 0x600   :  { %2353 = vrcp.f32 %v421_v59  ;;  %v583_v8 = vsel %vm291_vm5, %v578_v5, 0  ;;  %v2325_v59 = vld [vmem:[%s2929_s5] sm:$0xff]  }
 0x602   :  { %v2352_v60 = vpop.eup %2351 }
 0x603   :  { %v424_v61 = vmul.f32 %v2352_v60, %v2348_v54  ;;  %v478_v62 = vpop.permute.xlu0 %477  ;;  %v576_v12 = vpop.permute.xlu1 %575  ;;  %v2326_v60 = vld [vmem:[%s2929_s5 + $0x8] sm:$0xff]  }
 0x604   :  { %v483_v0 = vsel %vm433_vm9, %v478_v62, 0 }
 0x605   :  { %2142 = vmatpush3.bf16.msra.mxu0 %v483_v0  ;;  %v426_v1 = vpack.c.bf16 %v424_v61, %v424_v61 }
 0x606   :  { %2153 = vmatprep.subr.bf16.mxu0 %v2428_v11 }
 0x607   :  { %2138 = vmatmul.mubr.msk.bf16.vlgmr.msra.gmra.mrb[12].mxu1 %vm403_vm8, %v426_v1  ;;  %v526_v7 = vpop.permute.xlu0 %525 }
 0x608   :  { %2148 = vmatpush3.bf16.xpose.msra.mxu1 %v533_v2  ;;  %2149 = vmatprep.mubr.msk.bf16.mxu1 %vm2430_vm4, %v2428_v11 }
 0x609   :  { %2159 = vmatprep.subr.bf16.mxu1 %v2428_v11 }
 0x60a   :  { %v2354_v3 = vpop.eup %2353 }
 0x60b   :  { %v425_v4 = vmul.f32 %v2354_v3, %v2350_v56 }
 0x60d   :  { %v427_v6 = vpack.c.bf16 %v425_v4, %v425_v4 }
 0x60f   :  { %2144 = vmatmul.mubr.msk.bf16.vlgmr.msra.gmra.mrb[4].mxu0 %vm403_vm8, %v427_v6  ;;  %2150 = vmatmul.mubr.msk.bf16.vlgmr.msra.gmra.mrb[16].mxu1 %vm291_vm5, %v526_v7 }
 0x610   :  { %2154 = vmatpush3.bf16.xpose.msra.mxu0 %v583_v8  ;;  %2155 = vmatprep.mubr.msk.bf16.mxu0 %vm2430_vm4, %v2428_v11 }
 0x611   :  { %2165 = vmatprep.subr.bf16.mxu0 %v2428_v11  ;;  %2161 = vmatprep.mubr.msk.bf16.mxu1 %vm2430_vm4, %v2428_v11 }
 0x617   :  { %2156 = vmatmul.mubr.msk.bf16.vlgmr.msra.gmra.mrb[8].mxu0 %vm291_vm5, %v576_v12 }
 0x618   :  { %2167 = vmatprep.mubr.msk.bf16.mxu0 %vm2430_vm4, %v2428_v11 }
 0x6da   :  { %v2638_v13 = vpop.f32.mrb[12].mxu1 }
 0x6db   :  { %v2139_v14 = vpop.f32.mrb[13].mxu1 }
 0x6dc   :  { %v474_v15 = vpop.f32.mrb[14].mxu1 }
 0x6dd   :  { %v2140_v16 = vpop.f32.mrb[15].mxu1 }
 0x6de   :  { %v1950_v16 = vld [vmem:[%s2927_s3 + $0x1] ss:$0 sm:$0xff] }
 0x6e2   :  { %v2640_v17 = vpop.f32.mrb[4].mxu0  ;;  %v569_v19 = vpop.f32.mrb[16].mxu1 }
 0x6e3   :  { %v625_v20 = vmul.f32 0.25, %v569_v19  ;;  %v2145_v22 = vpop.f32.mrb[5].mxu0  ;;  %v2151_v23 = vpop.f32.mrb[17].mxu1 }
 0x6e4   :  { %v522_v24 = vpop.f32.mrb[6].mxu0  ;;  %v572_v25 = vpop.f32.mrb[18].mxu1 }
 0x6e5   :  { %v2146_v26 = vpop.f32.mrb[7].mxu0  ;;  %v2152_v27 = vpop.f32.mrb[19].mxu1  ;;  %v627_v28 = vadd.f32 %v625_v20, %v2594_v30 }
 0x6e7   :  { %v629_v31 = vsel %vm403_vm8, %v627_v28, -inf }
 0x6e8   :  { %630 = vmax.xlane.f32.xlu0 %v629_v31 }
 0x6ea   :  { %v619_v32 = vpop.f32.mrb[8].mxu0 }
 0x6eb   :  { %v626_v33 = vmul.f32 0.25, %v619_v32  ;;  %v2157_v34 = vpop.f32.mrb[9].mxu0 }
 0x6ec   :  { %v622_v35 = vpop.f32.mrb[10].mxu0 }
 0x6ed   :  { %v2158_v36 = vpop.f32.mrb[11].mxu0  ;;  %v628_v37 = vadd.f32 %v626_v33, %v2600_v39 }
 0x6ef   :  { %v632_v38 = vsel %vm403_vm8, %v628_v37, -inf }
 0x6f0   :  { %633 = vmax.xlane.f32.xlu1 %v632_v38 }
 0x701   :  { %653 = vrot.lane.b32.xlu1 %v2566_v18, %s2435_s23 }
 0x775   :  { %v631_v40 = vpop.xlane.xlu0 %630 }
 0x776   :  { %v635_v41 = vsub.f32 %v627_v28, %v631_v40  ;;  %v2328_v40 = vld [vmem:[%s2930_s6 + $0x8] sm:$0xff]  }
 0x778   :  { %v637_v42 = vmul.f32 1.442695, %v635_v41 }
 0x77a   :  { %2355 = vpow2.f32 %v637_v42 }
 0x77d   :  { %v634_v43 = vpop.xlane.xlu1 %633 }
 0x77e   :  { %v636_v44 = vsub.f32 %v628_v37, %v634_v43 }
 0x780   :  { %v639_v45 = vmul.f32 1.442695, %v636_v44 }
 0x781   :  { %v654_v46 = vpop.permute.xlu1 %653 }
 0x782   :  { %2357 = vpow2.f32 %v639_v45  ;;  %v659_v47 = vsel %vm433_vm9, %v654_v46, 0 }
 0x783   :  { %2160 = vmatpush3.bf16.msra.mxu1 %v659_v47 }
 0x784   :  { %v2356_v48 = vpop.eup %2355  ;;  %2171 = vmatprep.subr.bf16.mxu1 %v2428_v11 }
 0x785   :  { %v641_v49 = vsel %vm403_vm8, %v2356_v48, 0.0 }
 0x786   :  { %642 = vadd.xlane.f32.xlu0 %v641_v49 }
 0x78c   :  { %v2358_v29 = vpop.eup %2357 }
 0x78d   :  { %v644_v18 = vsel %vm403_vm8, %v2358_v29, 0.0 }
 0x78e   :  { %645 = vadd.xlane.f32.xlu0 %v644_v18 }
 0x7a4   :  { %701 = vrot.lane.b32.xlu0 %v2568_v21, %s2435_s23 }
 0x813   :  { %v643_v50 = vpop.xlane.xlu0 %642 }
 0x814   :  { %2359 = vrcp.f32 %v643_v50 }
 0x81b   :  { %v646_v51 = vpop.xlane.xlu0 %645 }
 0x81c   :  { %2361 = vrcp.f32 %v646_v51  ;;  %v1955_v51 = vld [vmem:[%s2927_s3 + $0x3] ss:$0 sm:$0xff] }
 0x81e   :  { %v2360_v52 = vpop.eup %2359 }
 0x81f   :  { %v649_v53 = vmul.f32 %v2360_v52, %v2356_v48  ;;  %v702_v54 = vpop.permute.xlu0 %701  ;;  %v1954_v48 = vld [vmem:[%s2927_s3 + $0x2] ss:$0 sm:$0xff] }
 0x820   :  { %v707_v55 = vsel %vm433_vm9, %v702_v54, 0 }
 0x821   :  { %2166 = vmatpush3.bf16.msra.mxu0 %v707_v55  ;;  %v651_v56 = vpack.c.bf16 %v649_v53, %v649_v53 }
 0x822   :  { %2179 = vmatprep.subr.bf16.mxu0 %v2428_v11 }
 0x823   :  { %2162 = vmatmul.mubr.msk.bf16.vlgmr.msra.gmra.mrb[20].mxu1 %vm403_vm8, %v651_v56  ;;  %v2329_v56 = vld [vmem:[%s2931_s7] sm:$0xff]  }
 0x824   :  { %2175 = vmatprep.mubr.msk.bf16.mxu1 %vm2430_vm4, %v2428_v11  ;;  %2172 = vmatpush3.bf16.msra.mxu1 %v2325_v59  ;;  %v1956_v59 = vld [vmem:[%s2927_s3 + $0x4] ss:$0 sm:$0xff] }
 0x825   :  { %2173 = vmatprep.subr.bf16.mxu1 %v2428_v11 }
 0x826   :  { %v2362_v57 = vpop.eup %2361 }
 0x827   :  { %v650_v21 = vmul.f32 %v2362_v57, %v2358_v29  ;;  %v2330_v57 = vld [vmem:[%s2931_s7 + $0x8] sm:$0xff]  }
 0x828   :  { %2174 = vmatpush3.bf16.msra.mxu1 %v2326_v60 }
 0x829   :  { %v652_v58 = vpack.c.bf16 %v650_v21, %v650_v21  ;;  %2187 = vmatprep.subr.bf16.mxu1 %v2428_v11  ;;  %v2331_v21 = vld [vmem:[%s2931_s7 + $0x10] sm:$0xff]  }
 0x82b   :  { %2168 = vmatmul.mubr.msk.bf16.vlgmr.msra.gmra.mrb[12].mxu0 %vm403_vm8, %v652_v58  ;;  %v2332_v58 = vld [vmem:[%s2931_s7 + $0x18] sm:$0xff]  }
 0x82c   :  { %2183 = vmatprep.mubr.msk.bf16.mxu0 %vm2430_vm4, %v2428_v11 }
 0x8f6   :  { %v695_v61 = vpop.f32.mrb[20].mxu1 }
 0x8f7   :  { %v2163_v62 = vpop.f32.mrb[21].mxu1 }
 0x8f8   :  { %v698_v63 = vpop.f32.mrb[22].mxu1 }
 0x8f9   :  { %v2164_v0 = vpop.f32.mrb[23].mxu1 }
 0x8fe   :  { %v743_v1 = vpop.f32.mrb[12].mxu0 }
 0x8ff   :  { %v2312_v2 = vpack.i.bf16 %v743_v1, %v695_v61  ;;  %v2169_v3 = vpop.f32.mrb[13].mxu0 }
 0x900   :  { %v746_v4 = vpop.f32.mrb[14].mxu0 }
 0x901   :  { %v2170_v5 = vpop.f32.mrb[15].mxu0  ;;  %2313 = vrot.lane.b32.xlu1 %v2312_v2, %s2436_s28 }
 0x973   :  { %v2314_v6 = vpop.permute.xlu1 %2313 }
 0x974   :  { %v2316_v7 = vunpack.i.h.bf16 %v2314_v6  ;;  %v2315_v8 = vunpack.i.l.bf16 %v2314_v6 }
 0x976   :  { %v758_v12 = vsel %vm291_vm5, %v2640_v17, %v2316_v7  ;;  %v757_v14 = vsel %vm291_vm5, %v2638_v13, %v2315_v8 }
 0x977   :  { %v763_v15 = vpack.c.bf16 %v758_v12, %v757_v14 }
 0x979   :  { %2176 = vmatmul.mubr.msk.bf16.vlgmr.msra.gmra.mrb[24].mxu1 %vm167_vm3, %v763_v15 }
 0x97a   :  { %2195 = vmatprep.mubr.msk.bf16.mxu1 %vm2430_vm4, %v2428_v11  ;;  %2188 = vmatpush3.bf16.msra.mxu1 %v2329_v56 }
 0x97b   :  { %2189 = vmatprep.subr.bf16.mxu1 %v2428_v11 }
 0x97e   :  { %2190 = vmatpush3.bf16.msra.mxu1 %v2330_v57 }
 0x97f   :  { %2191 = vmatprep.subr.bf16.mxu1 %v2428_v11 }
 0x982   :  { %2192 = vmatpush3.bf16.msra.mxu1 %v2331_v21 }
 0x983   :  { %2193 = vmatprep.subr.bf16.mxu1 %v2428_v11 }
 0x986   :  { %2194 = vmatpush3.bf16.msra.mxu1 %v2332_v58 }
 0x987   :  { %2213 = vmatprep.subr.bf16.mxu1 %v2428_v11 }
 0xa4c   :  { %v817_v19 = vpop.f32.mrb[24].mxu1 }
 0xa4d   :  { %v818_v20 = vadd.f32 %v1950_v16, %v817_v19  ;;  %v2177_v22 = vpop.f32.mrb[25].mxu1 }
 0xa4e   :  { %v820_v23 = vpop.f32.mrb[26].mxu1 }
 0xa4f   :  { %v821_v24 = vadd.f32 %v1950_v16, %v820_v23  ;;  %v2178_v25 = vpop.f32.mrb[27].mxu1  ;;  %v824_v17 = vadd.f32 %v818_v20, %v2554_v9 }
 0xa51   :  { %v826_v13 = vsel %vm167_vm3, %v824_v17, 0.0  ;;  %v825_v26 = vadd.f32 %v821_v24, %v2556_v10  ;;  %v2327_v10 = vld [vmem:[%s2930_s6] sm:$0xff]  }
 0xa52   :  { %827 = vadd.xlane.f32.xlu1 %v826_v13  ;;  %2180 = vmatpush3.bf16.msra.mxu0 %v2327_v10 }
 0xa53   :  { %v829_v27 = vsel %vm167_vm3, %v825_v26, 0.0  ;;  %2181 = vmatprep.subr.bf16.mxu0 %v2428_v11 }
 0xa54   :  { %830 = vadd.xlane.f32.xlu0 %v829_v27 }
 0xa56   :  { %2182 = vmatpush3.bf16.msra.mxu0 %v2328_v40 }
 0xa57   :  { %2199 = vmatprep.subr.bf16.mxu0 %v2428_v11 }
 0xadf   :  { %v828_v28 = vpop.xlane.xlu1 %827 }
 0xae0   :  { %v832_v31 = vmul.f32 0.03125, %v828_v28 }
 0xae1   :  { %v831_v32 = vpop.xlane.xlu0 %830 }
 0xae2   :  { %v834_v33 = vsub.f32 %v824_v17, %v832_v31  ;;  %v833_v34 = vmul.f32 0.03125, %v831_v32 }
 0xae4   :  { %v835_v35 = vsub.f32 %v825_v26, %v833_v34  ;;  %v836_v36 = vmul.f32 %v834_v33, %v834_v33  ;;  %v1960_v26 = vld [vmem:[%s2927_s3 + $0x5] ss:$0 sm:$0xff] }
 0xae6   :  { %v838_v37 = vsel %vm167_vm3, %v836_v36, 0.0  ;;  %v837_v38 = vmul.f32 %v835_v35, %v835_v35 }
 0xae7   :  { %839 = vadd.xlane.f32.xlu0 %v838_v37 }
 0xae8   :  { %v841_v9 = vsel %vm167_vm3, %v837_v38, 0.0 }
 0xae9   :  { %842 = vadd.xlane.f32.xlu1 %v841_v9 }
 0xb74   :  { %v840_v41 = vpop.xlane.xlu0 %839 }
 0xb75   :  { %v844_v42 = vmul.f32 0.03125, %v840_v41 }
 0xb76   :  { %v843_v43 = vpop.xlane.xlu1 %842 }
 0xb77   :  { %v846_v44 = vadd.f32 1e-12, %v844_v42  ;;  %v845_v45 = vmul.f32 0.03125, %v843_v43 }
 0xb79   :  { %2363 = vrsqrt.f32 %v846_v44  ;;  %v847_v46 = vadd.f32 1e-12, %v845_v45 }
 0xb7b   :  { %2365 = vrsqrt.f32 %v847_v46 }
 0xb83   :  { %v2364_v47 = vpop.eup %2363 }
 0xb84   :  { %v850_v49 = vmul.f32 %v2364_v47, %v834_v33 }
 0xb85   :  { %v2366_v29 = vpop.eup %2365 }
 0xb86   :  { %v856_v18 = vmul.f32 %v1954_v48, %v850_v49  ;;  %v851_v50 = vmul.f32 %v2366_v29, %v835_v35  ;;  %v2334_v49 = vld [vmem:[%s2928_s4 + $0x18] sm:$0xff]  }
 0xb88   :  { %v857_v52 = vmul.f32 %v1954_v48, %v851_v50  ;;  %v862_v53 = vadd.f32 %v1955_v51, %v856_v18  ;;  %v2333_v48 = vld [vmem:[%s2928_s4 + $0x10] sm:$0xff]  }
 0xb8a   :  { %v863_v54 = vadd.f32 %v1955_v51, %v857_v52 }
 0xb8c   :  { %v868_v55 = vpack.c.bf16 %v863_v54, %v862_v53 }
 0xb8e   :  { %2184 = vmatmul.mubr.msk.bf16.vlgmr.msra.gmra.mrb[16].mxu0 %vm167_vm3, %v868_v55  ;;  %v1966_v55 = vld [vmem:[%s2927_s3 + $0x6] ss:$0 sm:$0xff] }
 0xb8f   :  { %2203 = vmatprep.mubr.msk.bf16.mxu0 %vm2430_vm4, %v2428_v11  ;;  %2200 = vmatpush3.bf16.msra.mxu0 %v2333_v48 }
 0xb90   :  { %2201 = vmatprep.subr.bf16.mxu0 %v2428_v11 }
 0xb93   :  { %2202 = vmatpush3.bf16.msra.mxu0 %v2334_v49 }
 0xb94   :  { %2207 = vmatprep.subr.bf16.mxu0 %v2428_v11 }
 0xc61   :  { %v922_v60 = vpop.f32.mrb[16].mxu0 }
 0xc62   :  { %v923_v61 = vadd.f32 %v1956_v59, %v922_v60  ;;  %v2185_v62 = vpop.f32.mrb[17].mxu0 }
 0xc63   :  { %v925_v63 = vpop.f32.mrb[18].mxu0 }
 0xc64   :  { %v929_v0 = vmul.f32 %v923_v61, %v923_v61  ;;  %v926_v1 = vadd.f32 %v1956_v59, %v925_v63  ;;  %v2186_v2 = vpop.f32.mrb[19].mxu0  ;;  %v1967_v59 = vld [vmem:[%s2927_s3 + $0x7] ss:$0 sm:$0xff] }
 0xc66   :  { %v931_v3 = vmul.f32 %v929_v0, %v923_v61  ;;  %v930_v4 = vmul.f32 %v926_v1, %v926_v1  ;;  %v1980_v0 = vld [vmem:[%s2927_s3 + $0x8] ss:$0 sm:$0xff] }
 0xc68   :  { %v933_v5 = vmul.f32 0.044715, %v931_v3  ;;  %v932_v6 = vmul.f32 %v930_v4, %v926_v1 }
 0xc6a   :  { %v935_v7 = vadd.f32 %v933_v5, %v923_v61  ;;  %v934_v8 = vmul.f32 0.044715, %v932_v6 }
 0xc6c   :  { %v937_v12 = vmul.f32 0.7978846, %v935_v7  ;;  %v936_v14 = vadd.f32 %v934_v8, %v926_v1 }
 0xc6e   :  { %2367 = vtanh.f32 %v937_v12  ;;  %v938_v15 = vmul.f32 0.7978846, %v936_v14 }
 0xc70   :  { %2369 = vtanh.f32 %v938_v15 }
 0xc78   :  { %v2368_v16 = vpop.eup %2367 }
 0xc79   :  { %v941_v19 = vadd.f32 1.0, %v2368_v16 }
 0xc7a   :  { %v2370_v20 = vpop.eup %2369 }
 0xc7b   :  { %v943_v22 = vmul.f32 0.5, %v941_v19  ;;  %v942_v23 = vadd.f32 1.0, %v2370_v20 }
 0xc7d   :  { %v944_v24 = vmul.f32 0.5, %v942_v23  ;;  %v945_v25 = vmul.f32 %v943_v22, %v923_v61 }
 0xc7f   :  { %v946_v17 = vmul.f32 %v944_v24, %v926_v1 }
 0xc81   :  { %v955_v13 = vpack.c.bf16 %v946_v17, %v945_v25 }
 0xc83   :  { %2196 = vmatmul.mubr.msk.bf16.vlgmr.msra.gmra.mrb[28].mxu1 %vm81_vm0, %v955_v13 }
 0xc84   :  { %2215 = vmatprep.mubr.msk.bf16.mxu1 %vm2430_vm4, %v2428_v11 }
 0xd56   :  { %v1021_v27 = vpop.f32.mrb[28].mxu1 }
 0xd57   :  { %v1022_v28 = vadd.f32 %v1960_v26, %v1021_v27  ;;  %v2197_v31 = vpop.f32.mrb[29].mxu1 }
 0xd58   :  { %v1024_v32 = vpop.f32.mrb[30].mxu1 }
 0xd59   :  { %v1025_v33 = vadd.f32 %v1960_v26, %v1024_v32  ;;  %v2198_v34 = vpop.f32.mrb[31].mxu1  ;;  %v1028_v35 = vadd.f32 %v1022_v28, %v862_v53 }
 0xd5b   :  { %v1030_v36 = vsel %vm167_vm3, %v1028_v35, 0.0  ;;  %v1029_v37 = vadd.f32 %v1025_v33, %v863_v54 }
 0xd5c   :  { %1031 = vadd.xlane.f32.xlu0 %v1030_v36 }
 0xd5d   :  { %v1033_v38 = vsel %vm167_vm3, %v1029_v37, 0.0 }
 0xd5e   :  { %1034 = vadd.xlane.f32.xlu1 %v1033_v38 }
 0xde9   :  { %v1032_v9 = vpop.xlane.xlu0 %1031 }
 0xdea   :  { %v1036_v10 = vmul.f32 0.03125, %v1032_v9 }
 0xdeb   :  { %v1035_v40 = vpop.xlane.xlu1 %1034 }
 0xdec   :  { %v1038_v41 = vsub.f32 %v1028_v35, %v1036_v10  ;;  %v1037_v42 = vmul.f32 0.03125, %v1035_v40 }
 0xdee   :  { %v1039_v43 = vsub.f32 %v1029_v37, %v1037_v42  ;;  %v1040_v44 = vmul.f32 %v1038_v41, %v1038_v41 }
 0xdf0   :  { %v1042_v45 = vsel %vm167_vm3, %v1040_v44, 0.0  ;;  %v1041_v46 = vmul.f32 %v1039_v43, %v1039_v43 }
 0xdf1   :  { %1043 = vadd.xlane.f32.xlu0 %v1042_v45 }
 0xdf2   :  { %v1045_v47 = vsel %vm167_vm3, %v1041_v46, 0.0 }
 0xdf3   :  { %1046 = vadd.xlane.f32.xlu1 %v1045_v47 }
 0xe7e   :  { %v1044_v29 = vpop.xlane.xlu0 %1043 }
 0xe7f   :  { %v1048_v18 = vmul.f32 0.03125, %v1044_v29 }
 0xe80   :  { %v1047_v50 = vpop.xlane.xlu1 %1046 }
 0xe81   :  { %v1050_v51 = vadd.f32 1e-12, %v1048_v18  ;;  %v1049_v52 = vmul.f32 0.03125, %v1047_v50 }
 0xe83   :  { %2371 = vrsqrt.f32 %v1050_v51  ;;  %v1051_v53 = vadd.f32 1e-12, %v1049_v52 }
 0xe85   :  { %2373 = vrsqrt.f32 %v1051_v53 }
 0xe8d   :  { %v2372_v54 = vpop.eup %2371 }
 0xe8e   :  { %v1054_v56 = vmul.f32 %v2372_v54, %v1038_v41 }
 0xe8f   :  { %v2374_v57 = vpop.eup %2373 }
 0xe90   :  { %v1060_v21 = vmul.f32 %v1966_v55, %v1054_v56  ;;  %v1055_v58 = vmul.f32 %v2374_v57, %v1039_v43 }
 0xe92   :  { %v1061_v60 = vmul.f32 %v1966_v55, %v1055_v58  ;;  %v2747_v61 = vadd.f32 %v1967_v59, %v1060_v21 }
 0xe94   :  { %v2749_v62 = vadd.f32 %v1967_v59, %v1061_v60 }
 0xe96   :  { %v1082_v63 = vpack.c.bf16 %v2749_v62, %v2747_v61 }
 0xe98   :  { %2204 = vmatmul.mubr.msk.bf16.vlgmr.msra.gmra.mrb[20].mxu0 %vm167_vm3, %v1082_v63 }
 0xe99   :  { %2209 = vmatprep.mubr.msk.bf16.mxu0 %vm2430_vm4, %v2428_v11 }
 0xf6b   :  { %v1136_v1 = vpop.f32.mrb[20].mxu0 }
 0xf6c   :  { %v1137_v2 = vadd.f32 %v1980_v0, %v1136_v1  ;;  %v2205_v3 = vpop.f32.mrb[21].mxu0 }
 0xf6d   :  { %v1139_v4 = vpop.f32.mrb[22].mxu0 }
 0xf6e   :  { %v2759_v5 = vpack.c.bf16 %v1137_v2, %v1137_v2  ;;  %v1140_v6 = vadd.f32 %v1980_v0, %v1139_v4  ;;  %v2206_v7 = vpop.f32.mrb[23].mxu0 }
 0xf70   :  { %v2761_v8 = vpack.c.bf16 %v1140_v6, %v1140_v6  ;;  %1146 = vrot.lane.b32.xlu0 %v2759_v5, %s2431_s2 }
 0xf72   :  { %1195 = vrot.lane.b32.xlu1 %v2761_v8, %s2431_s2 }
 0xfe2   :  { %v1147_v12 = vpop.permute.xlu0 %1146 }
 0xfe3   :  { %v1152_v14 = vsel %vm291_vm5, %v1147_v12, 0 }
 0xfe4   :  { %2208 = vmatpush3.bf16.xpose.msra.mxu0 %v1152_v14  ;;  %v1196_v15 = vpop.permute.xlu1 %1195 }
 0xfe5   :  { %v1201_v16 = vsel %vm291_vm5, %v1196_v15, 0  ;;  %2219 = vmatprep.subr.bf16.mxu0 %v2428_v11 }
 0xfe6   :  { %2214 = vmatpush3.bf16.xpose.msra.mxu1 %v1201_v16 }
 0xfe7   :  { %2225 = vmatprep.subr.bf16.mxu1 %v2428_v11 }
 0xfeb   :  { %2210 = vmatmul.mubr.msk.bf16.vlgmr.msra.gmra.mrb[24].mxu0 %vm291_vm5, %v2759_v5 }
 0xfec   :  { %2221 = vmatprep.mubr.msk.bf16.mxu0 %vm2430_vm4, %v2428_v11 }
 0xfed   :  { %2216 = vmatmul.mubr.msk.bf16.vlgmr.msra.gmra.mrb[32].mxu1 %vm291_vm5, %v2761_v8 }
 0xfee   :  { %2227 = vmatprep.mubr.msk.bf16.mxu1 %vm2430_vm4, %v2428_v11 }
0x10be   :  { %v1188_v19 = vpop.f32.mrb[24].mxu0 }
0x10bf   :  { %v1243_v20 = vmul.f32 0.25, %v1188_v19  ;;  %v2211_v22 = vpop.f32.mrb[25].mxu0 }
0x10c0   :  { %v1191_v23 = vpop.f32.mrb[26].mxu0  ;;  %v1237_v24 = vpop.f32.mrb[32].mxu1 }
0x10c1   :  { %v1244_v25 = vmul.f32 0.25, %v1237_v24  ;;  %v2212_v17 = vpop.f32.mrb[27].mxu0  ;;  %v2217_v13 = vpop.f32.mrb[33].mxu1  ;;  %v1245_v26 = vadd.f32 %v1243_v20, %v2594_v30 }
0x10c2   :  { %v1240_v27 = vpop.f32.mrb[34].mxu1 }
0x10c3   :  { %v2218_v28 = vpop.f32.mrb[35].mxu1  ;;  %v1247_v31 = vsel %vm403_vm8, %v1245_v26, -inf  ;;  %v1246_v32 = vadd.f32 %v1244_v25, %v2600_v39 }
0x10c4   :  { %1248 = vmax.xlane.f32.xlu1 %v1247_v31 }
0x10c5   :  { %v1250_v33 = vsel %vm403_vm8, %v1246_v32, -inf }
0x10c6   :  { %1251 = vmax.xlane.f32.xlu0 %v1250_v33 }
0x10d5   :  { %1319 = vrot.lane.b32.xlu1 %v2761_v8, %s2432_s1 }
0x10dc   :  { %1271 = vrot.lane.b32.xlu0 %v2759_v5, %s2432_s1  ;;  %s2437_s1 = smov [#allocation2]  }
0x1151   :  { %v1249_v34 = vpop.xlane.xlu1 %1248 }
0x1152   :  { %v1253_v35 = vsub.f32 %v1245_v26, %v1249_v34 }
0x1153   :  { %v1252_v36 = vpop.xlane.xlu0 %1251 }
0x1154   :  { %v1255_v37 = vmul.f32 1.442695, %v1253_v35  ;;  %v1254_v38 = vsub.f32 %v1246_v32, %v1252_v36 }
0x1155   :  { %v1320_v9 = vpop.permute.xlu1 %1319 }
0x1156   :  { %2375 = vpow2.f32 %v1255_v37  ;;  %v1257_v10 = vmul.f32 1.442695, %v1254_v38  ;;  %v1325_v40 = vsel %vm433_vm9, %v1320_v9, 0 }
0x1157   :  { %2226 = vmatpush3.bf16.msra.mxu1 %v1325_v40  ;;  %v1272_v41 = vpop.permute.xlu0 %1271 }
0x1158   :  { %2377 = vpow2.f32 %v1257_v10  ;;  %v1277_v42 = vsel %vm433_vm9, %v1272_v41, 0  ;;  %2237 = vmatprep.subr.bf16.mxu1 %v2428_v11 }
0x1159   :  { %2220 = vmatpush3.bf16.msra.mxu0 %v1277_v42 }
0x115a   :  { %2231 = vmatprep.subr.bf16.mxu0 %v2428_v11 }
0x1160   :  { %v2376_v43 = vpop.eup %2375 }
0x1161   :  { %v1259_v44 = vsel %vm403_vm8, %v2376_v43, 0.0 }
0x1162   :  { %v2378_v45 = vpop.eup %2377  ;;  %1260 = vadd.xlane.f32.xlu0 %v1259_v44  ;;  %v2335_v44 = vld [vmem:[%s2929_s5 + $0x10] sm:$0xff]  }
0x1163   :  { %v1262_v46 = vsel %vm403_vm8, %v2378_v45, 0.0 }
0x1164   :  { %1263 = vadd.xlane.f32.xlu1 %v1262_v46 }
0x1175   :  { %1369 = vrot.lane.b32.xlu1 %v2759_v5, %s2433_s22 }
0x1178   :  { %1419 = vrot.lane.b32.xlu0 %v2761_v8, %s2433_s22  ;;  %s1926_s22 = sshll.u32 %s2437_s1, 4  ;;  %s1927_s22 = int_to_ptr.vmem [resolvable:$true] %s1926_s22 }
0x1179   :  { %1367 = vrot.lane.b32.xlu1 %v2759_v5, %s2434_s0  ;;  %p2408_p1 = scmp.lt.s32.totalorder %s1927_s22, %s1927_s22 }
0x117c   :  { %1417 = vrot.lane.b32.xlu0 %v2761_v8, %s2434_s0  ;;  %s2403_s0 = scalar_lea.vmem %s1927_s22, 32 }
0x117d   :  { %p2404_p0 = scmp.ne.s32.totalorder %s1927_s22, %s2403_s0  ;;  %p2409_p2 = scmp.lt.s32.totalorder %s2403_s0, %s2403_s0 }
0x117f   :  { %p2410_p3 = por %p2409_p2, %p2408_p1 }
0x1181   :  { %p2411_p4 = pnand %p2410_p3, %p2404_p0 }
0x11ef   :  { %v1261_v47 = vpop.xlane.xlu0 %1260 }
0x11f0   :  { %2379 = vrcp.f32 %v1261_v47 }
0x11f1   :  { %v1264_v48 = vpop.xlane.xlu1 %1263 }
0x11f2   :  { %2381 = vrcp.f32 %v1264_v48 }
0x11f3   :  { %v1420_v53 = vpop.permute.xlu0 %1419 }
0x11f4   :  { %v1425_v56 = vsel %vm291_vm5, %v1420_v53, 0 }
0x11f5   :  { %v1370_v50 = vpop.permute.xlu1 %1369 }
0x11f6   :  { %v1375_v54 = vsel %vm291_vm5, %v1370_v50, 0 }
0x11f7   :  { %v1418_v21 = vpop.permute.xlu0 %1417 }
0x11f9   :  { %v1368_v57 = vpop.permute.xlu1 %1367 }
0x11fa   :  { %v2380_v49 = vpop.eup %2379 }
0x11fb   :  { %v1267_v29 = vmul.f32 %v2380_v49, %v2376_v43 }
0x11fc   :  { %v2382_v18 = vpop.eup %2381 }
0x11fd   :  { %v1268_v51 = vmul.f32 %v2382_v18, %v2378_v45  ;;  %v1269_v52 = vpack.c.bf16 %v1267_v29, %v1267_v29  ;;  %v2336_v45 = vld [vmem:[%s2929_s5 + $0x18] sm:$0xff]  }
0x11ff   :  { %2222 = vmatmul.mubr.msk.bf16.vlgmr.msra.gmra.mrb[28].mxu0 %vm403_vm8, %v1269_v52  ;;  %v1270_v55 = vpack.c.bf16 %v1268_v51, %v1268_v51 }
0x1200   :  { %2232 = vmatpush3.bf16.xpose.msra.mxu0 %v1375_v54  ;;  %2233 = vmatprep.mubr.msk.bf16.mxu0 %vm2430_vm4, %v2428_v11 }
0x1201   :  { %2228 = vmatmul.mubr.msk.bf16.vlgmr.msra.gmra.mrb[36].mxu1 %vm403_vm8, %v1270_v55  ;;  %2243 = vmatprep.subr.bf16.mxu0 %v2428_v11 }
0x1202   :  { %2238 = vmatpush3.bf16.xpose.msra.mxu1 %v1425_v56  ;;  %2239 = vmatprep.mubr.msk.bf16.mxu1 %vm2430_vm4, %v2428_v11 }
0x1203   :  { %2249 = vmatprep.subr.bf16.mxu1 %v2428_v11 }
0x1207   :  { %2234 = vmatmul.mubr.msk.bf16.vlgmr.msra.gmra.mrb[32].mxu0 %vm291_vm5, %v1368_v57 }
0x1208   :  { %2245 = vmatprep.mubr.msk.bf16.mxu0 %vm2430_vm4, %v2428_v11 }
0x1209   :  { %2240 = vmatmul.mubr.msk.bf16.vlgmr.msra.gmra.mrb[40].mxu1 %vm291_vm5, %v1418_v21 }
0x120a   :  { %2251 = vmatprep.mubr.msk.bf16.mxu1 %vm2430_vm4, %v2428_v11 }
0x12d2   :  { %v2817_v58 = vpop.f32.mrb[28].mxu0 }
0x12d3   :  { %v2223_v59 = vpop.f32.mrb[29].mxu0 }
0x12d4   :  { %v1316_v60 = vpop.f32.mrb[30].mxu0  ;;  %v2819_v63 = vpop.f32.mrb[36].mxu1  ;;  %v1996_v59 = vld [vmem:[%s2927_s3 + $0x9] ss:$0 sm:$0xff] }
0x12d5   :  { %v2224_v0 = vpop.f32.mrb[31].mxu0  ;;  %v2229_v1 = vpop.f32.mrb[37].mxu1 }
0x12d6   :  { %v1364_v2 = vpop.f32.mrb[38].mxu1 }
0x12d7   :  { %v2230_v3 = vpop.f32.mrb[39].mxu1 }
0x12da   :  { %v1411_v4 = vpop.f32.mrb[32].mxu0 }
0x12db   :  { %v1467_v6 = vmul.f32 0.25, %v1411_v4  ;;  %v2235_v7 = vpop.f32.mrb[33].mxu0 }
0x12dc   :  { %v1414_v12 = vpop.f32.mrb[34].mxu0  ;;  %v1461_v14 = vpop.f32.mrb[40].mxu1 }
0x12dd   :  { %v1468_v15 = vmul.f32 0.25, %v1461_v14  ;;  %v2236_v16 = vpop.f32.mrb[35].mxu0  ;;  %v2241_v19 = vpop.f32.mrb[41].mxu1  ;;  %v1469_v20 = vadd.f32 %v1467_v6, %v2594_v30 }
0x12de   :  { %v1464_v22 = vpop.f32.mrb[42].mxu1 }
0x12df   :  { %v2242_v23 = vpop.f32.mrb[43].mxu1  ;;  %v1471_v24 = vsel %vm403_vm8, %v1469_v20, -inf  ;;  %v1470_v25 = vadd.f32 %v1468_v15, %v2600_v39 }
0x12e0   :  { %1472 = vmax.xlane.f32.xlu1 %v1471_v24 }
0x12e1   :  { %v1474_v17 = vsel %vm403_vm8, %v1470_v25, -inf }
0x12e2   :  { %1475 = vmax.xlane.f32.xlu0 %v1474_v17 }
0x136d   :  { %v1473_v13 = vpop.xlane.xlu1 %1472 }
0x136e   :  { %v1477_v26 = vsub.f32 %v1469_v20, %v1473_v13 }
0x136f   :  { %v1476_v27 = vpop.xlane.xlu0 %1475 }
0x1370   :  { %v1479_v28 = vmul.f32 1.442695, %v1477_v26  ;;  %v1478_v31 = vsub.f32 %v1470_v25, %v1476_v27  ;;  %v2338_v25 = vld [vmem:[%s2930_s6 + $0x18] sm:$0xff]  }
0x1372   :  { %2383 = vpow2.f32 %v1479_v28  ;;  %v1481_v32 = vmul.f32 1.442695, %v1478_v31 }
0x1374   :  { %2385 = vpow2.f32 %v1481_v32 }
0x137c   :  { %v2384_v33 = vpop.eup %2383 }
0x137d   :  { %v1483_v30 = vsel %vm403_vm8, %v2384_v33, 0.0 }
0x137e   :  { %v2386_v34 = vpop.eup %2385  ;;  %1484 = vadd.xlane.f32.xlu0 %v1483_v30  ;;  %v2000_v30 = vld [vmem:[%s2927_s3 + $0xa] ss:$0 sm:$0xff] }
0x137f   :  { %v1486_v35 = vsel %vm403_vm8, %v2386_v34, 0.0 }
0x1380   :  { %1487 = vadd.xlane.f32.xlu1 %v1486_v35 }
0x1391   :  { %1543 = vrot.lane.b32.xlu1 %v2761_v8, %s2435_s23 }
0x1394   :  { %1495 = vrot.lane.b32.xlu0 %v2759_v5, %s2435_s23 }
0x140b   :  { %v1485_v39 = vpop.xlane.xlu0 %1484 }
0x140c   :  { %2387 = vrcp.f32 %v1485_v39 }
0x140d   :  { %v1488_v36 = vpop.xlane.xlu1 %1487 }
0x140e   :  { %2389 = vrcp.f32 %v1488_v36  ;;  %v2001_v36 = vld [vmem:[%s2927_s3 + $0xb] ss:$0 sm:$0xff] }
0x140f   :  { %v1496_v37 = vpop.permute.xlu0 %1495 }
0x1410   :  { %v1501_v38 = vsel %vm433_vm9, %v1496_v37, 0 }
0x1411   :  { %v1544_v9 = vpop.permute.xlu1 %1543  ;;  %2244 = vmatpush3.bf16.msra.mxu0 %v1501_v38 }
0x1412   :  { %v1549_v10 = vsel %vm433_vm9, %v1544_v9, 0  ;;  %2255 = vmatprep.subr.bf16.mxu0 %v2428_v11 }
0x1413   :  { %2250 = vmatpush3.bf16.msra.mxu1 %v1549_v10 }
0x1414   :  { %2263 = vmatprep.subr.bf16.mxu1 %v2428_v11 }
0x1416   :  { %v2388_v8 = vpop.eup %2387 }
0x1417   :  { %v1491_v40 = vmul.f32 %v2388_v8, %v2384_v33  ;;  %v2339_v8 = vld [vmem:[%s2931_s7 + $0x20] sm:$0xff]  }
0x1418   :  { %v2390_v41 = vpop.eup %2389 }
0x1419   :  { %v1492_v5 = vmul.f32 %v2390_v41, %v2386_v34  ;;  %v1493_v42 = vpack.c.bf16 %v1491_v40, %v1491_v40  ;;  %v2340_v40 = vld [vmem:[%s2931_s7 + $0x28] sm:$0xff]   ;;  %v2341_v41 = vld [vmem:[%s2931_s7 + $0x30] sm:$0xff]  }
0x141b   :  { %2246 = vmatmul.mubr.msk.bf16.vlgmr.msra.gmra.mrb[36].mxu0 %vm403_vm8, %v1493_v42  ;;  %v1494_v43 = vpack.c.bf16 %v1492_v5, %v1492_v5  ;;  %v2342_v5 = vld [vmem:[%s2931_s7 + $0x38] sm:$0xff]   ;;  %v2006_v42 = vld [vmem:[%s2927_s3 + $0xc] ss:$0 sm:$0xff] }
0x141c   :  { %2259 = vmatprep.mubr.msk.bf16.mxu0 %vm2430_vm4, %v2428_v11  ;;  %2256 = vmatpush3.bf16.msra.mxu0 %v2335_v44 }
0x141d   :  { %2252 = vmatmul.mubr.msk.bf16.vlgmr.msra.gmra.mrb[44].mxu1 %vm403_vm8, %v1494_v43  ;;  %2257 = vmatprep.subr.bf16.mxu0 %v2428_v11 }
0x141e   :  { %2267 = vmatprep.mubr.msk.bf16.mxu1 %vm2430_vm4, %v2428_v11 }
0x1420   :  { %2258 = vmatpush3.bf16.msra.mxu0 %v2336_v45 }
0x1421   :  { %2271 = vmatprep.subr.bf16.mxu0 %v2428_v11 }
0x14ee   :  { %v1537_v46 = vpop.f32.mrb[36].mxu0 }
0x14ef   :  { %v2247_v47 = vpop.f32.mrb[37].mxu0 }
0x14f0   :  { %v1540_v48 = vpop.f32.mrb[38].mxu0  ;;  %v1585_v49 = vpop.f32.mrb[44].mxu1 }
0x14f1   :  { %v2317_v29 = vpack.i.bf16 %v1585_v49, %v1537_v46  ;;  %v2248_v18 = vpop.f32.mrb[39].mxu0  ;;  %v2253_v50 = vpop.f32.mrb[45].mxu1 }
0x14f2   :  { %v1588_v51 = vpop.f32.mrb[46].mxu1 }
0x14f3   :  { %2318 = vrot.lane.b32.xlu1 %v2317_v29, %s2436_s28  ;;  %v2254_v52 = vpop.f32.mrb[47].mxu1 }
0x1565   :  { %v2319_v53 = vpop.permute.xlu1 %2318 }
0x1566   :  { %v2321_v54 = vunpack.i.h.bf16 %v2319_v53  ;;  %v2320_v55 = vunpack.i.l.bf16 %v2319_v53 }
0x1568   :  { %v1600_v56 = vsel %vm291_vm5, %v2819_v63, %v2321_v54  ;;  %v1599_v57 = vsel %vm291_vm5, %v2817_v58, %v2320_v55 }
0x1569   :  { %v1606_v21 = vpack.c.bf16 %v1600_v56, %v1599_v57 }
0x156b   :  { %2260 = vmatmul.mubr.msk.bf16.vlgmr.msra.gmra.mrb[40].mxu0 %vm167_vm3, %v1606_v21 }
0x156c   :  { %2279 = vmatprep.mubr.msk.bf16.mxu0 %vm2430_vm4, %v2428_v11  ;;  %2272 = vmatpush3.bf16.msra.mxu0 %v2339_v8  ;;  %v2025_v8 = vld [vmem:[%s2927_s3 + $0xf] ss:$0 sm:$0xff] }
0x156d   :  { %2273 = vmatprep.subr.bf16.mxu0 %v2428_v11 }
0x1570   :  { %2274 = vmatpush3.bf16.msra.mxu0 %v2340_v40 }
0x1571   :  { %2275 = vmatprep.subr.bf16.mxu0 %v2428_v11 }
0x1574   :  { %2276 = vmatpush3.bf16.msra.mxu0 %v2341_v41 }
0x1575   :  { %2277 = vmatprep.subr.bf16.mxu0 %v2428_v11 }
0x1578   :  { %2278 = vmatpush3.bf16.msra.mxu0 %v2342_v5 }
0x163e   :  { %v1660_v60 = vpop.f32.mrb[40].mxu0 }
0x163f   :  { %v1661_v0 = vadd.f32 %v1996_v59, %v1660_v60  ;;  %v2261_v1 = vpop.f32.mrb[41].mxu0 }
0x1640   :  { %v1663_v2 = vpop.f32.mrb[42].mxu0 }
0x1641   :  { %v1664_v3 = vadd.f32 %v1996_v59, %v1663_v2  ;;  %v2262_v4 = vpop.f32.mrb[43].mxu0  ;;  %v1667_v63 = vadd.f32 %v1661_v0, %v2747_v61 }
0x1642   :  { %v2018_v4 = vld [vmem:[%s2927_s3 + $0xd] ss:$0 sm:$0xff] }
0x1643   :  { %v1669_v58 = vsel %vm167_vm3, %v1667_v63, 0.0  ;;  %v1668_v6 = vadd.f32 %v1664_v3, %v2749_v62  ;;  %v2337_v62 = vld [vmem:[%s2930_s6 + $0x10] sm:$0xff]  }
0x1644   :  { %1670 = vadd.xlane.f32.xlu0 %v1669_v58  ;;  %2264 = vmatpush3.bf16.msra.mxu1 %v2337_v62 }
0x1645   :  { %v1672_v7 = vsel %vm167_vm3, %v1668_v6, 0.0  ;;  %2265 = vmatprep.subr.bf16.mxu1 %v2428_v11 }
0x1646   :  { %1673 = vadd.xlane.f32.xlu1 %v1672_v7 }
0x1648   :  { %2266 = vmatpush3.bf16.msra.mxu1 %v2338_v25 }
0x16d1   :  { %v1671_v12 = vpop.xlane.xlu0 %1670 }
0x16d2   :  { %v1675_v14 = vmul.f32 0.03125, %v1671_v12 }
0x16d3   :  { %v1674_v15 = vpop.xlane.xlu1 %1673 }
0x16d4   :  { %v1677_v16 = vsub.f32 %v1667_v63, %v1675_v14  ;;  %v1676_v19 = vmul.f32 0.03125, %v1674_v15 }
0x16d6   :  { %v1678_v20 = vsub.f32 %v1668_v6, %v1676_v19  ;;  %v1679_v22 = vmul.f32 %v1677_v16, %v1677_v16 }
0x16d8   :  { %v1681_v23 = vsel %vm167_vm3, %v1679_v22, 0.0  ;;  %v1680_v24 = vmul.f32 %v1678_v20, %v1678_v20 }
0x16d9   :  { %1682 = vadd.xlane.f32.xlu0 %v1681_v23 }
0x16da   :  { %v1684_v61 = vsel %vm167_vm3, %v1680_v24, 0.0 }
0x16dd   :  { %1685 = vadd.xlane.f32.xlu0 %v1684_v61 }
0x1766   :  { %v1683_v17 = vpop.xlane.xlu0 %1682 }
0x1767   :  { %v1687_v13 = vmul.f32 0.03125, %v1683_v17 }
0x1769   :  { %v1689_v26 = vadd.f32 1e-12, %v1687_v13 }
0x176a   :  { %v1686_v27 = vpop.xlane.xlu0 %1685 }
0x176b   :  { %2391 = vrsqrt.f32 %v1689_v26  ;;  %v1688_v28 = vmul.f32 0.03125, %v1686_v27 }
0x176d   :  { %v1690_v31 = vadd.f32 1e-12, %v1688_v28 }
0x176f   :  { %2393 = vrsqrt.f32 %v1690_v31 }
0x1775   :  { %v2392_v32 = vpop.eup %2391 }
0x1776   :  { %v1693_v33 = vmul.f32 %v2392_v32, %v1677_v16 }
0x1778   :  { %v1699_v35 = vmul.f32 %v2000_v30, %v1693_v33 }
0x1779   :  { %v2394_v34 = vpop.eup %2393 }
0x177a   :  { %v1694_v39 = vmul.f32 %v2394_v34, %v1678_v20  ;;  %v1705_v38 = vadd.f32 %v2001_v36, %v1699_v35 }
0x177c   :  { %v1700_v37 = vmul.f32 %v2000_v30, %v1694_v39 }
0x177e   :  { %v1706_v9 = vadd.f32 %v2001_v36, %v1700_v37  ;;  %v2024_v37 = vld [vmem:[%s2927_s3 + $0xe] ss:$0 sm:$0xff] }
0x1780   :  { %v1712_v10 = vpack.c.bf16 %v1706_v9, %v1705_v38 }
0x1782   :  { %2268 = vmatmul.mubr.msk.bf16.vlgmr.msra.gmra.mrb[48].mxu1 %vm167_vm3, %v1712_v10 }
0x1855   :  { %v1766_v43 = vpop.f32.mrb[48].mxu1 }
0x1856   :  { %v1767_v44 = vadd.f32 %v2006_v42, %v1766_v43  ;;  %v2269_v45 = vpop.f32.mrb[49].mxu1 }
0x1857   :  { %v1769_v46 = vpop.f32.mrb[50].mxu1 }
0x1858   :  { %v1773_v47 = vmul.f32 %v1767_v44, %v1767_v44  ;;  %v1770_v48 = vadd.f32 %v2006_v42, %v1769_v46  ;;  %v2270_v49 = vpop.f32.mrb[51].mxu1 }
0x185a   :  { %v1775_v29 = vmul.f32 %v1773_v47, %v1767_v44  ;;  %v1774_v18 = vmul.f32 %v1770_v48, %v1770_v48 }
0x185c   :  { %v1777_v50 = vmul.f32 0.044715, %v1775_v29  ;;  %v1776_v11 = vmul.f32 %v1774_v18, %v1770_v48 }
0x185e   :  { %v1779_v51 = vadd.f32 %v1777_v50, %v1767_v44  ;;  %v1778_v52 = vmul.f32 0.044715, %v1776_v11 }
0x1860   :  { %v1781_v53 = vmul.f32 0.7978846, %v1779_v51  ;;  %v1780_v54 = vadd.f32 %v1778_v52, %v1770_v48 }
0x1862   :  { %2395 = vtanh.f32 %v1781_v53  ;;  %v1782_v55 = vmul.f32 0.7978846, %v1780_v54 }
0x1864   :  { %2397 = vtanh.f32 %v1782_v55 }
0x186c   :  { %v2396_v56 = vpop.eup %2395 }
0x186d   :  { %v1785_v57 = vadd.f32 1.0, %v2396_v56 }
0x186e   :  { %v2398_v21 = vpop.eup %2397 }
0x186f   :  { %v1787_v59 = vmul.f32 0.5, %v1785_v57  ;;  %v1786_v60 = vadd.f32 1.0, %v2398_v21 }
0x1871   :  { %v1788_v0 = vmul.f32 0.5, %v1786_v60  ;;  %v1789_v1 = vmul.f32 %v1787_v59, %v1767_v44 }
0x1873   :  { %v1790_v2 = vmul.f32 %v1788_v0, %v1770_v48 }
0x1875   :  { %v1800_v3 = vpack.c.bf16 %v1790_v2, %v1789_v1 }
0x1877   :  { %2280 = vmatmul.mubr.msk.bf16.vlgmr.msra.gmra.mrb[44].mxu0 %vm81_vm0, %v1800_v3 }
0x194a   :  { %v1866_v63 = vpop.f32.mrb[44].mxu0 }
0x194b   :  { %v1867_v58 = vadd.f32 %v2018_v4, %v1866_v63  ;;  %v2281_v6 = vpop.f32.mrb[45].mxu0 }
0x194c   :  { %v1869_v7 = vpop.f32.mrb[46].mxu0 }
0x194d   :  { %v1870_v12 = vadd.f32 %v2018_v4, %v1869_v7  ;;  %v2282_v14 = vpop.f32.mrb[47].mxu0  ;;  %v1873_v15 = vadd.f32 %v1867_v58, %v1705_v38 }
0x194f   :  { %v1875_v16 = vsel %vm167_vm3, %v1873_v15, 0.0  ;;  %v1874_v19 = vadd.f32 %v1870_v12, %v1706_v9 }
0x1950   :  { %1876 = vadd.xlane.f32.xlu0 %v1875_v16 }
0x1951   :  { %v1878_v20 = vsel %vm167_vm3, %v1874_v19, 0.0 }
0x1952   :  { %1879 = vadd.xlane.f32.xlu1 %v1878_v20 }
0x19dd   :  { %v1877_v22 = vpop.xlane.xlu0 %1876 }
0x19de   :  { %v1881_v23 = vmul.f32 0.03125, %v1877_v22 }
0x19df   :  { %v1880_v24 = vpop.xlane.xlu1 %1879 }
0x19e0   :  { %v1883_v61 = vsub.f32 %v1873_v15, %v1881_v23  ;;  %v1882_v62 = vmul.f32 0.03125, %v1880_v24 }
0x19e2   :  { %v1884_v25 = vsub.f32 %v1874_v19, %v1882_v62  ;;  %v1885_v17 = vmul.f32 %v1883_v61, %v1883_v61 }
0x19e4   :  { %v1887_v13 = vsel %vm167_vm3, %v1885_v17, 0.0  ;;  %v1886_v26 = vmul.f32 %v1884_v25, %v1884_v25 }
0x19e5   :  { %1888 = vadd.xlane.f32.xlu0 %v1887_v13 }
0x19e6   :  { %v1890_v27 = vsel %vm167_vm3, %v1886_v26, 0.0 }
0x19e7   :  { %1891 = vadd.xlane.f32.xlu1 %v1890_v27 }
0x1a72   :  { %v1889_v28 = vpop.xlane.xlu0 %1888 }
0x1a73   :  { %v1893_v31 = vmul.f32 0.03125, %v1889_v28 }
0x1a74   :  { %v1892_v32 = vpop.xlane.xlu1 %1891 }
0x1a75   :  { %v1895_v33 = vadd.f32 1e-12, %v1893_v31  ;;  %v1894_v30 = vmul.f32 0.03125, %v1892_v32 }
0x1a77   :  { %2399 = vrsqrt.f32 %v1895_v33  ;;  %v1896_v34 = vadd.f32 1e-12, %v1894_v30 }
0x1a79   :  { %2401 = vrsqrt.f32 %v1896_v34 }
0x1a81   :  { %v2400_v35 = vpop.eup %2399 }
0x1a82   :  { %v1899_v39 = vmul.f32 %v2400_v35, %v1883_v61 }
0x1a83   :  { %v2402_v36 = vpop.eup %2401 }
0x1a84   :  { %v1900_v38 = vmul.f32 %v2402_v36, %v1884_v25  ;;  %v1905_v9 = vmul.f32 %v2024_v37, %v1899_v39 }
0x1a86   :  { %v1906_v10 = vmul.f32 %v2024_v37, %v1900_v38  ;;  %v1911_v41 = vadd.f32 %v2025_v8, %v1905_v9 }
0x1a88   :  { %v1912_v40 = vadd.f32 %v2025_v8, %v1906_v10 }
0x1a8a   :  { %v1914_v5 = vrot.slane %v1912_v40, 7 }
0x1a8c   :  { %v1917_v42 = vsel %vm1916_vm10, %v1911_v41, %v1914_v5 }
0x1a8d   :  { %1919 = vst.msk [vmem:[#allocation2] sm:$0x3] %vm1918_vm11, %v1917_v42 }
0x1a8e   :  { %2414 = shalt.err (!%p2411_p4)
}
0x1a8f   :  { %s2415_s3 = scalar_lea.hbm %s2932_s8, 32 }
0x1a90   :  { %p2416_p5 = scmp.ne.s32.totalorder %s2932_s8, %s2415_s3  ;;  %p2419_p6 = scmp.lt.u32.totalorder %s2415_s3, %s2932_s8 }
0x1a92   :  { %p2421_p7 = pnand %p2419_p6, %p2416_p5 }
0x1a94   :  { %2424 = shalt.err (!%p2421_p7)
}
0x1a95   :  { %1929 = dma.vmem_to_hbm [thread:$0]  %s1927_s22, 32, %s2932_s8, [#allocation3]  }
0x1a96   :  { %2425 = dma.done.wait [#allocation3], 32  }
0x1a97   :  { %2426 = vsyncadd [#allocation3], 4294967264 }
0x1a98   :  { %1933 = vsyncpa [#allocation3], 1 }

</bundles_post_ra>
